<compile_context>
chip_gen: v6e
topology: v6e:2x2x1
jax: 0.10.0
libtpu: 0.0.40
codegen_flags: <defaults>
</compile_context>

<pallas_src>
import math

import jax
import jax.numpy as jnp
from jax.experimental import pallas as pl
from jax.experimental.pallas import tpu as pltpu

# ----------------------------- tiny BERT config -----------------------------
B = 2            # batch
S = 8            # sequence length
H = 32           # hidden size
NH = 2           # attention heads
DH = H // NH     # head dim
I = 64           # intermediate (FFN) size
V = 128          # vocab size
L = 2            # num encoder layers
MAX_POS = 64
LN_EPS = 1e-12
NEG_BIG = -1e9   # bounded additive-mask fill (safer than finfo(f32).min)


# ------------------------------ fused kernel --------------------------------
def fused_forward_kernel(
        x_ref, pos_ref, mask_ref,
        emb_g_ref, emb_b_ref,
        wqkv_ref, bqkv_ref, wo_ref, bo_ref, ln1_g_ref, ln1_b_ref,
        w1_ref, b1_ref, w2_ref, b2_ref, ln2_g_ref, ln2_b_ref,
        mlm_w_ref, mlm_b_ref, mlm_g_ref, mlm_beta_ref,
        dec_w_ref, dec_b_ref,
        logits_ref, hidden_ref):
    scale = 1.0 / math.sqrt(DH)
    inv_sqrt2 = 1.0 / math.sqrt(2.0)

    def layernorm(h, g, b):
        mu = jnp.mean(h, axis=-1, keepdims=True)
        d = h - mu
        var = jnp.mean(d * d, axis=-1, keepdims=True)
        return d * jax.lax.rsqrt(var + LN_EPS) * g + b

    def gelu(x):
        # exact GELU (erf), matching PyTorch/HF "gelu"
        return 0.5 * x * (1.0 + jax.lax.erf(x * inv_sqrt2))

    # --- embeddings: inputs + pos + token-type(0), then LayerNorm ---
    pt = pos_ref[...]                                   # (S, H)
    pos_full = jnp.concatenate([pt] * B, axis=0)        # (B*S, H), in-kernel bcast
    h = layernorm(x_ref[...] + pos_full, emb_g_ref[...], emb_b_ref[...])

    am = mask_ref[...]                                  # (B, S) additive mask

    # --- encoder layers (static unroll; L is tiny) ---
    for l in range(L):
        wqkv_l = wqkv_ref[l]        # (H, 3H)   fused Q/K/V weights
        bqkv_l = bqkv_ref[l]        # (1, 3H)
        wo_l = wo_ref[l]            # (H, H)

        # single fused QKV matmul, slice in-kernel
        qkv = jnp.dot(h, wqkv_l, preferred_element_type=jnp.float32) + bqkv_l
        q = qkv[:, 0:H]
        k = qkv[:, H:2 * H]
        v = qkv[:, 2 * H:3 * H]

        # attention; output projection folded per head (no lane concat)
        batch_outs = []
        for b in range(B):
            r0, r1 = b * S, (b + 1) * S
            qb = q[r0:r1, :]
            kb = k[r0:r1, :]
            vb = v[r0:r1, :]
            mb = am[b:b + 1, :]                         # (1, S)
            acc = None
            for hd in range(NH):
                c0, c1 = hd * DH, (hd + 1) * DH
                s = jnp.dot(qb[:, c0:c1], kb[:, c0:c1].T,
                            preferred_element_type=jnp.float32) * scale
                s = s + mb                              # broadcast over query rows
                mx = jnp.max(s, axis=-1, keepdims=True)
                p = jnp.exp(s - mx)
                denom = jnp.sum(p, axis=-1, keepdims=True)   # >= 1 by construction
                p = p * pl.reciprocal(denom, approx=True)    # EUP, not VALU divide
                ctx_h = jnp.dot(p, vb[:, c0:c1],
                                preferred_element_type=jnp.float32)    # (S, DH)
                contrib = jnp.dot(ctx_h, wo_l[c0:c1, :],
                                  preferred_element_type=jnp.float32)  # (S, H)
                acc = contrib if acc is None else acc + contrib
            batch_outs.append(acc)
        attn_out = jnp.concatenate(batch_outs, axis=0) + bo_ref[l]     # (B*S, H)

        # residual + LayerNorm (fused epilogue)
        h = layernorm(attn_out + h, ln1_g_ref[l], ln1_b_ref[l])

        # feed-forward with GELU, residual + LayerNorm epilogue
        inter = gelu(jnp.dot(h, w1_ref[l],
                             preferred_element_type=jnp.float32) + b1_ref[l])
        ffn_out = jnp.dot(inter, w2_ref[l],
                          preferred_element_type=jnp.float32) + b2_ref[l]
        h = layernorm(ffn_out + h, ln2_g_ref[l], ln2_b_ref[l])

    hidden_ref[...] = h

    # --- MLM head: dense + gelu + LayerNorm + decoder-to-vocab ---
    t = gelu(jnp.dot(h, mlm_w_ref[...],
                     preferred_element_type=jnp.float32) + mlm_b_ref[...])
    t = layernorm(t, mlm_g_ref[...], mlm_beta_ref[...])
    logits_ref[...] = (jnp.dot(t, dec_w_ref[...],
                               preferred_element_type=jnp.float32)
                       + dec_b_ref[...])


# ------------------------------ parameter init ------------------------------
def init_params(key):
    """Synthetic deterministic tiny-BERT params, pre-stacked per layer."""
    def nrm(k, shape, scale=0.02):
        return (scale * jax.random.normal(k, shape)).astype(jnp.float32)

    ks = iter(jax.random.split(key, 16))
    return {
        "pos_emb": nrm(next(ks), (MAX_POS, H)),
        "type_emb": nrm(next(ks), (2, H)),
        "emb_ln_g": jnp.ones((1, H), jnp.float32),
        "emb_ln_b": jnp.zeros((1, H), jnp.float32),
        # per-layer params stacked along a leading L axis; Q/K/V fused to 3H
        "wqkv": nrm(next(ks), (L, H, 3 * H)),
        "bqkv": jnp.zeros((L, 1, 3 * H), jnp.float32),
        "wo": nrm(next(ks), (L, H, H)),
        "bo": jnp.zeros((L, 1, H), jnp.float32),
        "ln1_g": jnp.ones((L, 1, H), jnp.float32),
        "ln1_b": jnp.zeros((L, 1, H), jnp.float32),
        "w1": nrm(next(ks), (L, H, I)),
        "b1": jnp.zeros((L, 1, I), jnp.float32),
        "w2": nrm(next(ks), (L, I, H)),
        "b2": jnp.zeros((L, 1, H), jnp.float32),
        "ln2_g": jnp.ones((L, 1, H), jnp.float32),
        "ln2_b": jnp.zeros((L, 1, H), jnp.float32),
        # MLM head
        "mlm_dense_w": nrm(next(ks), (H, H)),
        "mlm_dense_b": jnp.zeros((1, H), jnp.float32),
        "mlm_ln_g": jnp.ones((1, H), jnp.float32),
        "mlm_ln_b": jnp.zeros((1, H), jnp.float32),
        "dec_w": nrm(next(ks), (H, V)),
        "dec_b": jnp.zeros((1, V), jnp.float32),
    }
    # TODO(synk): tokenizer / pretrained-checkpoint loading from HuggingFace has
    # no Pallas equivalent; weights are synthetic deterministic tensors.


# ------------------------------- forward pass --------------------------------
def llm_decoder_forward(params, inputs_embeds, attention_mask=None,
                        output_hidden_states=True):
    """Mirrors LLMDecoder.forward: returns logits or (logits, last_hidden)."""
    Bx, Sx, Hx = inputs_embeds.shape
    M = Bx * Sx
    if attention_mask is None:
        attention_mask = jnp.ones((Bx, Sx), jnp.float32)

    x = inputs_embeds.reshape(M, Hx).astype(jnp.float32)
    # pos + token-type(0) residual stays (S, H); broadcast over batch in-kernel.
    pos_type = params["pos_emb"][:Sx] + params["type_emb"][0:1]        # (S, H)
    # HF-style additive attention mask, bounded fill value.
    addmask = (1.0 - attention_mask.astype(jnp.float32)) * NEG_BIG     # (B, S)

    def fb(shape):
        nd = len(shape)
        return pl.BlockSpec(shape, lambda *_: (0,) * nd)

    args = (
        x, pos_type, addmask,
        params["emb_ln_g"], params["emb_ln_b"],
        params["wqkv"], params["bqkv"], params["wo"], params["bo"],
        params["ln1_g"], params["ln1_b"],
        params["w1"], params["b1"], params["w2"], params["b2"],
        params["ln2_g"], params["ln2_b"],
        params["mlm_dense_w"], params["mlm_dense_b"],
        params["mlm_ln_g"], params["mlm_ln_b"],
        params["dec_w"], params["dec_b"],
    )

    logits2d, hidden2d = pl.pallas_call(
        fused_forward_kernel,
        out_shape=(jax.ShapeDtypeStruct((M, V), jnp.float32),
                   jax.ShapeDtypeStruct((M, Hx), jnp.float32)),
        grid=(1,),
        in_specs=[fb(a.shape) for a in args],
        out_specs=[fb((M, V)), fb((M, Hx))],
        compiler_params=pltpu.CompilerParams(
            dimension_semantics=("arbitrary",)),
    )(*args)

    logits = logits2d.reshape(Bx, Sx, V)
    last_hidden = hidden2d.reshape(Bx, Sx, Hx)
    if not output_hidden_states:
        return logits
    return logits, last_hidden


# ----------------------------------- main ------------------------------------
if __name__ == "__main__":
    key = jax.random.PRNGKey(0)
    pkey, xkey = jax.random.split(key)
    params = init_params(pkey)

    inputs_embeds = jax.random.normal(xkey, (B, S, H), dtype=jnp.float32)
    attention_mask = jnp.array(
        [[1, 1, 1, 1, 1, 1, 1, 1],
         [1, 1, 1, 1, 1, 1, 0, 0]], dtype=jnp.float32)

    logits, last_hidden = llm_decoder_forward(
        params, inputs_embeds, attention_mask, output_hidden_states=True)
    jax.block_until_ready((logits, last_hidden))

    assert logits.shape == (B, S, V)
    assert last_hidden.shape == (B, S, H)
    assert bool(jnp.all(jnp.isfinite(logits)))
    assert bool(jnp.all(jnp.isfinite(last_hidden)))
    print("KERNEL_OK")
</pallas_src>

<mosaic_0001>
module attributes {stable_mosaic.version = 11 : i64} {
  func.func @fused_forward_kernel(%arg0: i32, %arg1: memref<16x32xf32, #tpu.memory_space<vmem>>, %arg2: memref<8x32xf32, #tpu.memory_space<vmem>>, %arg3: memref<2x8xf32, #tpu.memory_space<vmem>>, %arg4: memref<1x32xf32, #tpu.memory_space<vmem>>, %arg5: memref<1x32xf32, #tpu.memory_space<vmem>>, %arg6: memref<2x32x96xf32, #tpu.memory_space<vmem>>, %arg7: memref<2x1x96xf32, #tpu.memory_space<vmem>>, %arg8: memref<2x32x32xf32, #tpu.memory_space<vmem>>, %arg9: memref<2x1x32xf32, #tpu.memory_space<vmem>>, %arg10: memref<2x1x32xf32, #tpu.memory_space<vmem>>, %arg11: memref<2x1x32xf32, #tpu.memory_space<vmem>>, %arg12: memref<2x32x64xf32, #tpu.memory_space<vmem>>, %arg13: memref<2x1x64xf32, #tpu.memory_space<vmem>>, %arg14: memref<2x64x32xf32, #tpu.memory_space<vmem>>, %arg15: memref<2x1x32xf32, #tpu.memory_space<vmem>>, %arg16: memref<2x1x32xf32, #tpu.memory_space<vmem>>, %arg17: memref<2x1x32xf32, #tpu.memory_space<vmem>>, %arg18: memref<32x32xf32, #tpu.memory_space<vmem>>, %arg19: memref<1x32xf32, #tpu.memory_space<vmem>>, %arg20: memref<1x32xf32, #tpu.memory_space<vmem>>, %arg21: memref<1x32xf32, #tpu.memory_space<vmem>>, %arg22: memref<32x128xf32, #tpu.memory_space<vmem>>, %arg23: memref<1x128xf32, #tpu.memory_space<vmem>>, %arg24: memref<16x128xf32, #tpu.memory_space<vmem>>, %arg25: memref<16x32xf32, #tpu.memory_space<vmem>>) attributes {dimension_semantics = [#tpu.dimension_semantics<arbitrary>], iteration_bounds = array<i64: 1>, scalar_prefetch = 0 : i64, scratch_operands = 0 : i64, tpu.core_type = #tpu.core_type<tc>, window_params = [{pipeline_mode = #tpu.pipeline_mode<synchronous>, transform_indices = @transform_0, window_bounds = array<i64: 16, 32>}, {pipeline_mode = #tpu.pipeline_mode<synchronous>, transform_indices = @transform_1, window_bounds = array<i64: 8, 32>}, {pipeline_mode = #tpu.pipeline_mode<synchronous>, transform_indices = @transform_2, window_bounds = array<i64: 2, 8>}, {pipeline_mode = #tpu.pipeline_mode<synchronous>, transform_indices = @transform_3, window_bounds = array<i64: 1, 32>}, {pipeline_mode = #tpu.pipeline_mode<synchronous>, transform_indices = @transform_4, window_bounds = array<i64: 1, 32>}, {pipeline_mode = #tpu.pipeline_mode<synchronous>, transform_indices = @transform_5, window_bounds = array<i64: 2, 32, 96>}, {pipeline_mode = #tpu.pipeline_mode<synchronous>, transform_indices = @transform_6, window_bounds = array<i64: 2, 1, 96>}, {pipeline_mode = #tpu.pipeline_mode<synchronous>, transform_indices = @transform_7, window_bounds = array<i64: 2, 32, 32>}, {pipeline_mode = #tpu.pipeline_mode<synchronous>, transform_indices = @transform_8, window_bounds = array<i64: 2, 1, 32>}, {pipeline_mode = #tpu.pipeline_mode<synchronous>, transform_indices = @transform_9, window_bounds = array<i64: 2, 1, 32>}, {pipeline_mode = #tpu.pipeline_mode<synchronous>, transform_indices = @transform_10, window_bounds = array<i64: 2, 1, 32>}, {pipeline_mode = #tpu.pipeline_mode<synchronous>, transform_indices = @transform_11, window_bounds = array<i64: 2, 32, 64>}, {pipeline_mode = #tpu.pipeline_mode<synchronous>, transform_indices = @transform_12, window_bounds = array<i64: 2, 1, 64>}, {pipeline_mode = #tpu.pipeline_mode<synchronous>, transform_indices = @transform_13, window_bounds = array<i64: 2, 64, 32>}, {pipeline_mode = #tpu.pipeline_mode<synchronous>, transform_indices = @transform_14, window_bounds = array<i64: 2, 1, 32>}, {pipeline_mode = #tpu.pipeline_mode<synchronous>, transform_indices = @transform_15, window_bounds = array<i64: 2, 1, 32>}, {pipeline_mode = #tpu.pipeline_mode<synchronous>, transform_indices = @transform_16, window_bounds = array<i64: 2, 1, 32>}, {pipeline_mode = #tpu.pipeline_mode<synchronous>, transform_indices = @transform_17, window_bounds = array<i64: 32, 32>}, {pipeline_mode = #tpu.pipeline_mode<synchronous>, transform_indices = @transform_18, window_bounds = array<i64: 1, 32>}, {pipeline_mode = #tpu.pipeline_mode<synchronous>, transform_indices = @transform_19, window_bounds = array<i64: 1, 32>}, {pipeline_mode = #tpu.pipeline_mode<synchronous>, transform_indices = @transform_20, window_bounds = array<i64: 1, 32>}, {pipeline_mode = #tpu.pipeline_mode<synchronous>, transform_indices = @transform_21, window_bounds = array<i64: 32, 128>}, {pipeline_mode = #tpu.pipeline_mode<synchronous>, transform_indices = @transform_22, window_bounds = array<i64: 1, 128>}, {pipeline_mode = #tpu.pipeline_mode<synchronous>, transform_indices = @transform_23, window_bounds = array<i64: 16, 128>}, {pipeline_mode = #tpu.pipeline_mode<synchronous>, transform_indices = @transform_24, window_bounds = array<i64: 16, 32>}]} {
    %c0 = arith.constant 0 : index
    %c0_0 = arith.constant 0 : index
    %0 = vector.load %arg2[%c0, %c0_0] : memref<8x32xf32, #tpu.memory_space<vmem>>, vector<8x32xf32>
    %1 = tpu.concatenate %0, %0 in 0 : vector<8x32xf32>, vector<8x32xf32> -> vector<16x32xf32>
    %c0_1 = arith.constant 0 : index
    %c0_2 = arith.constant 0 : index
    %2 = vector.load %arg1[%c0_1, %c0_2] : memref<16x32xf32, #tpu.memory_space<vmem>>, vector<16x32xf32>
    %3 = arith.addf %2, %1 : vector<16x32xf32>
    %c0_3 = arith.constant 0 : index
    %c0_4 = arith.constant 0 : index
    %4 = vector.load %arg4[%c0_3, %c0_4] : memref<1x32xf32, #tpu.memory_space<vmem>>, vector<1x32xf32>
    %c0_5 = arith.constant 0 : index
    %c0_6 = arith.constant 0 : index
    %5 = vector.load %arg5[%c0_5, %c0_6] : memref<1x32xf32, #tpu.memory_space<vmem>>, vector<1x32xf32>
    %cst = arith.constant dense<0.000000e+00> : vector<16xf32>
    %6 = vector.multi_reduction <add>, %3, %cst [1] : vector<16x32xf32> to vector<16xf32>
    %7 = vector.shape_cast %6 : vector<16xf32> to vector<16x1xf32>
    %cst_7 = arith.constant 3.200000e+01 : f32
    %8 = vector.broadcast %cst_7 : f32 to vector<16x1xf32>
    %9 = arith.divf %7, %8 : vector<16x1xf32>
    %10 = vector.broadcast %9 : vector<16x1xf32> to vector<16x32xf32>
    %11 = arith.subf %3, %10 : vector<16x32xf32>
    %12 = arith.mulf %11, %11 : vector<16x32xf32>
    %cst_8 = arith.constant dense<0.000000e+00> : vector<16xf32>
    %13 = vector.multi_reduction <add>, %12, %cst_8 [1] : vector<16x32xf32> to vector<16xf32>
    %14 = vector.shape_cast %13 : vector<16xf32> to vector<16x1xf32>
    %cst_9 = arith.constant 3.200000e+01 : f32
    %15 = vector.broadcast %cst_9 : f32 to vector<16x1xf32>
    %16 = arith.divf %14, %15 : vector<16x1xf32>
    %cst_10 = arith.constant 9.99999996E-13 : f32
    %17 = vector.broadcast %cst_10 : f32 to vector<16x1xf32>
    %18 = arith.addf %16, %17 : vector<16x1xf32>
    %19 = math.rsqrt %18 : vector<16x1xf32>
    %20 = vector.broadcast %19 : vector<16x1xf32> to vector<16x32xf32>
    %21 = arith.mulf %11, %20 : vector<16x32xf32>
    %22 = vector.broadcast %4 : vector<1x32xf32> to vector<16x32xf32>
    %23 = arith.mulf %21, %22 : vector<16x32xf32>
    %24 = vector.broadcast %5 : vector<1x32xf32> to vector<16x32xf32>
    %25 = arith.addf %23, %24 : vector<16x32xf32>
    %c0_11 = arith.constant 0 : index
    %c0_12 = arith.constant 0 : index
    %26 = vector.load %arg3[%c0_11, %c0_12] : memref<2x8xf32, #tpu.memory_space<vmem>>, vector<2x8xf32>
    %c0_13 = arith.constant 0 : index
    %c0_14 = arith.constant 0 : index
    %c0_15 = arith.constant 0 : index
    %27 = vector.load %arg6[%c0_13, %c0_14, %c0_15] : memref<2x32x96xf32, #tpu.memory_space<vmem>>, vector<1x32x96xf32>
    %28 = vector.shape_cast %27 : vector<1x32x96xf32> to vector<32x96xf32>
    %c0_16 = arith.constant 0 : index
    %c0_17 = arith.constant 0 : index
    %c0_18 = arith.constant 0 : index
    %29 = vector.load %arg7[%c0_16, %c0_17, %c0_18] : memref<2x1x96xf32, #tpu.memory_space<vmem>>, vector<1x1x96xf32>
    %30 = vector.shape_cast %29 : vector<1x1x96xf32> to vector<1x96xf32>
    %c0_19 = arith.constant 0 : index
    %c0_20 = arith.constant 0 : index
    %c0_21 = arith.constant 0 : index
    %31 = vector.load %arg8[%c0_19, %c0_20, %c0_21] : memref<2x32x32xf32, #tpu.memory_space<vmem>>, vector<1x32x32xf32>
    %32 = vector.shape_cast %31 : vector<1x32x32xf32> to vector<32x32xf32>
    %cst_22 = arith.constant dense<0.000000e+00> : vector<16x96xf32>
    %33 = tpu.matmul %25, %28, %cst_22 {dimension_numbers = #tpu.dot_dimension_numbers<[1], [0], [0], [1], [0, 0, 1, 1], [], []>} : vector<16x32xf32>, vector<32x96xf32>, vector<16x96xf32> -> vector<16x96xf32>
    %34 = vector.broadcast %30 : vector<1x96xf32> to vector<16x96xf32>
    %35 = arith.addf %33, %34 : vector<16x96xf32>
    %36 = vector.extract_strided_slice %35 {offsets = [0, 0], sizes = [16, 32], strides = [1, 1]} : vector<16x96xf32> to vector<16x32xf32>
    %37 = vector.extract_strided_slice %35 {offsets = [0, 32], sizes = [16, 32], strides = [1, 1]} : vector<16x96xf32> to vector<16x32xf32>
    %38 = vector.extract_strided_slice %35 {offsets = [0, 64], sizes = [16, 32], strides = [1, 1]} : vector<16x96xf32> to vector<16x32xf32>
    %39 = vector.extract_strided_slice %36 {offsets = [0, 0], sizes = [8, 32], strides = [1, 1]} : vector<16x32xf32> to vector<8x32xf32>
    %40 = vector.extract_strided_slice %37 {offsets = [0, 0], sizes = [8, 32], strides = [1, 1]} : vector<16x32xf32> to vector<8x32xf32>
    %41 = vector.extract_strided_slice %38 {offsets = [0, 0], sizes = [8, 32], strides = [1, 1]} : vector<16x32xf32> to vector<8x32xf32>
    %42 = vector.extract_strided_slice %26 {offsets = [0, 0], sizes = [1, 8], strides = [1, 1]} : vector<2x8xf32> to vector<1x8xf32>
    %43 = vector.extract_strided_slice %39 {offsets = [0, 0], sizes = [8, 16], strides = [1, 1]} : vector<8x32xf32> to vector<8x16xf32>
    %44 = vector.extract_strided_slice %40 {offsets = [0, 0], sizes = [8, 16], strides = [1, 1]} : vector<8x32xf32> to vector<8x16xf32>
    %45 = tpu.transpose %44, [1, 0] : vector<8x16xf32> -> vector<16x8xf32>
    %cst_23 = arith.constant dense<0.000000e+00> : vector<8x8xf32>
    %46 = tpu.matmul %43, %45, %cst_23 {dimension_numbers = #tpu.dot_dimension_numbers<[1], [0], [0], [1], [0, 0, 1, 1], [], []>} : vector<8x16xf32>, vector<16x8xf32>, vector<8x8xf32> -> vector<8x8xf32>
    %cst_24 = arith.constant 2.500000e-01 : f32
    %47 = vector.broadcast %cst_24 : f32 to vector<8x8xf32>
    %48 = arith.mulf %46, %47 : vector<8x8xf32>
    %49 = vector.broadcast %42 : vector<1x8xf32> to vector<8x8xf32>
    %50 = arith.addf %48, %49 : vector<8x8xf32>
    %cst_25 = arith.constant dense<0xFF800000> : vector<8xf32>
    %51 = vector.multi_reduction <maximumf>, %50, %cst_25 [1] : vector<8x8xf32> to vector<8xf32>
    %52 = vector.shape_cast %51 : vector<8xf32> to vector<8x1xf32>
    %53 = vector.broadcast %52 : vector<8x1xf32> to vector<8x8xf32>
    %54 = arith.subf %50, %53 : vector<8x8xf32>
    %55 = math.exp %54 : vector<8x8xf32>
    %cst_26 = arith.constant dense<0.000000e+00> : vector<8xf32>
    %56 = vector.multi_reduction <add>, %55, %cst_26 [1] : vector<8x8xf32> to vector<8xf32>
    %57 = vector.shape_cast %56 : vector<8xf32> to vector<8x1xf32>
    %58 = tpu.reciprocal %57 {approx = true} : vector<8x1xf32> -> vector<8x1xf32>
    %59 = vector.broadcast %58 : vector<8x1xf32> to vector<8x8xf32>
    %60 = arith.mulf %55, %59 : vector<8x8xf32>
    %61 = vector.extract_strided_slice %41 {offsets = [0, 0], sizes = [8, 16], strides = [1, 1]} : vector<8x32xf32> to vector<8x16xf32>
    %cst_27 = arith.constant dense<0.000000e+00> : vector<8x16xf32>
    %62 = tpu.matmul %60, %61, %cst_27 {dimension_numbers = #tpu.dot_dimension_numbers<[1], [0], [0], [1], [0, 0, 1, 1], [], []>} : vector<8x8xf32>, vector<8x16xf32>, vector<8x16xf32> -> vector<8x16xf32>
    %63 = vector.extract_strided_slice %32 {offsets = [0, 0], sizes = [16, 32], strides = [1, 1]} : vector<32x32xf32> to vector<16x32xf32>
    %cst_28 = arith.constant dense<0.000000e+00> : vector<8x32xf32>
    %64 = tpu.matmul %62, %63, %cst_28 {dimension_numbers = #tpu.dot_dimension_numbers<[1], [0], [0], [1], [0, 0, 1, 1], [], []>} : vector<8x16xf32>, vector<16x32xf32>, vector<8x32xf32> -> vector<8x32xf32>
    %65 = vector.extract_strided_slice %39 {offsets = [0, 16], sizes = [8, 16], strides = [1, 1]} : vector<8x32xf32> to vector<8x16xf32>
    %66 = vector.extract_strided_slice %40 {offsets = [0, 16], sizes = [8, 16], strides = [1, 1]} : vector<8x32xf32> to vector<8x16xf32>
    %67 = tpu.transpose %66, [1, 0] : vector<8x16xf32> -> vector<16x8xf32>
    %cst_29 = arith.constant dense<0.000000e+00> : vector<8x8xf32>
    %68 = tpu.matmul %65, %67, %cst_29 {dimension_numbers = #tpu.dot_dimension_numbers<[1], [0], [0], [1], [0, 0, 1, 1], [], []>} : vector<8x16xf32>, vector<16x8xf32>, vector<8x8xf32> -> vector<8x8xf32>
    %cst_30 = arith.constant 2.500000e-01 : f32
    %69 = vector.broadcast %cst_30 : f32 to vector<8x8xf32>
    %70 = arith.mulf %68, %69 : vector<8x8xf32>
    %71 = vector.broadcast %42 : vector<1x8xf32> to vector<8x8xf32>
    %72 = arith.addf %70, %71 : vector<8x8xf32>
    %cst_31 = arith.constant dense<0xFF800000> : vector<8xf32>
    %73 = vector.multi_reduction <maximumf>, %72, %cst_31 [1] : vector<8x8xf32> to vector<8xf32>
    %74 = vector.shape_cast %73 : vector<8xf32> to vector<8x1xf32>
    %75 = vector.broadcast %74 : vector<8x1xf32> to vector<8x8xf32>
    %76 = arith.subf %72, %75 : vector<8x8xf32>
    %77 = math.exp %76 : vector<8x8xf32>
    %cst_32 = arith.constant dense<0.000000e+00> : vector<8xf32>
    %78 = vector.multi_reduction <add>, %77, %cst_32 [1] : vector<8x8xf32> to vector<8xf32>
    %79 = vector.shape_cast %78 : vector<8xf32> to vector<8x1xf32>
    %80 = tpu.reciprocal %79 {approx = true} : vector<8x1xf32> -> vector<8x1xf32>
    %81 = vector.broadcast %80 : vector<8x1xf32> to vector<8x8xf32>
    %82 = arith.mulf %77, %81 : vector<8x8xf32>
    %83 = vector.extract_strided_slice %41 {offsets = [0, 16], sizes = [8, 16], strides = [1, 1]} : vector<8x32xf32> to vector<8x16xf32>
    %cst_33 = arith.constant dense<0.000000e+00> : vector<8x16xf32>
    %84 = tpu.matmul %82, %83, %cst_33 {dimension_numbers = #tpu.dot_dimension_numbers<[1], [0], [0], [1], [0, 0, 1, 1], [], []>} : vector<8x8xf32>, vector<8x16xf32>, vector<8x16xf32> -> vector<8x16xf32>
    %85 = vector.extract_strided_slice %32 {offsets = [16, 0], sizes = [16, 32], strides = [1, 1]} : vector<32x32xf32> to vector<16x32xf32>
    %cst_34 = arith.constant dense<0.000000e+00> : vector<8x32xf32>
    %86 = tpu.matmul %84, %85, %cst_34 {dimension_numbers = #tpu.dot_dimension_numbers<[1], [0], [0], [1], [0, 0, 1, 1], [], []>} : vector<8x16xf32>, vector<16x32xf32>, vector<8x32xf32> -> vector<8x32xf32>
    %87 = arith.addf %64, %86 : vector<8x32xf32>
    %88 = vector.extract_strided_slice %36 {offsets = [8, 0], sizes = [8, 32], strides = [1, 1]} : vector<16x32xf32> to vector<8x32xf32>
    %89 = vector.extract_strided_slice %37 {offsets = [8, 0], sizes = [8, 32], strides = [1, 1]} : vector<16x32xf32> to vector<8x32xf32>
    %90 = vector.extract_strided_slice %38 {offsets = [8, 0], sizes = [8, 32], strides = [1, 1]} : vector<16x32xf32> to vector<8x32xf32>
    %91 = vector.extract_strided_slice %26 {offsets = [1, 0], sizes = [1, 8], strides = [1, 1]} : vector<2x8xf32> to vector<1x8xf32>
    %92 = vector.extract_strided_slice %88 {offsets = [0, 0], sizes = [8, 16], strides = [1, 1]} : vector<8x32xf32> to vector<8x16xf32>
    %93 = vector.extract_strided_slice %89 {offsets = [0, 0], sizes = [8, 16], strides = [1, 1]} : vector<8x32xf32> to vector<8x16xf32>
    %94 = tpu.transpose %93, [1, 0] : vector<8x16xf32> -> vector<16x8xf32>
    %cst_35 = arith.constant dense<0.000000e+00> : vector<8x8xf32>
    %95 = tpu.matmul %92, %94, %cst_35 {dimension_numbers = #tpu.dot_dimension_numbers<[1], [0], [0], [1], [0, 0, 1, 1], [], []>} : vector<8x16xf32>, vector<16x8xf32>, vector<8x8xf32> -> vector<8x8xf32>
    %cst_36 = arith.constant 2.500000e-01 : f32
    %96 = vector.broadcast %cst_36 : f32 to vector<8x8xf32>
    %97 = arith.mulf %95, %96 : vector<8x8xf32>
    %98 = vector.broadcast %91 : vector<1x8xf32> to vector<8x8xf32>
    %99 = arith.addf %97, %98 : vector<8x8xf32>
    %cst_37 = arith.constant dense<0xFF800000> : vector<8xf32>
    %100 = vector.multi_reduction <maximumf>, %99, %cst_37 [1] : vector<8x8xf32> to vector<8xf32>
    %101 = vector.shape_cast %100 : vector<8xf32> to vector<8x1xf32>
    %102 = vector.broadcast %101 : vector<8x1xf32> to vector<8x8xf32>
    %103 = arith.subf %99, %102 : vector<8x8xf32>
    %104 = math.exp %103 : vector<8x8xf32>
    %cst_38 = arith.constant dense<0.000000e+00> : vector<8xf32>
    %105 = vector.multi_reduction <add>, %104, %cst_38 [1] : vector<8x8xf32> to vector<8xf32>
    %106 = vector.shape_cast %105 : vector<8xf32> to vector<8x1xf32>
    %107 = tpu.reciprocal %106 {approx = true} : vector<8x1xf32> -> vector<8x1xf32>
    %108 = vector.broadcast %107 : vector<8x1xf32> to vector<8x8xf32>
    %109 = arith.mulf %104, %108 : vector<8x8xf32>
    %110 = vector.extract_strided_slice %90 {offsets = [0, 0], sizes = [8, 16], strides = [1, 1]} : vector<8x32xf32> to vector<8x16xf32>
    %cst_39 = arith.constant dense<0.000000e+00> : vector<8x16xf32>
    %111 = tpu.matmul %109, %110, %cst_39 {dimension_numbers = #tpu.dot_dimension_numbers<[1], [0], [0], [1], [0, 0, 1, 1], [], []>} : vector<8x8xf32>, vector<8x16xf32>, vector<8x16xf32> -> vector<8x16xf32>
    %112 = vector.extract_strided_slice %32 {offsets = [0, 0], sizes = [16, 32], strides = [1, 1]} : vector<32x32xf32> to vector<16x32xf32>
    %cst_40 = arith.constant dense<0.000000e+00> : vector<8x32xf32>
    %113 = tpu.matmul %111, %112, %cst_40 {dimension_numbers = #tpu.dot_dimension_numbers<[1], [0], [0], [1], [0, 0, 1, 1], [], []>} : vector<8x16xf32>, vector<16x32xf32>, vector<8x32xf32> -> vector<8x32xf32>
    %114 = vector.extract_strided_slice %88 {offsets = [0, 16], sizes = [8, 16], strides = [1, 1]} : vector<8x32xf32> to vector<8x16xf32>
    %115 = vector.extract_strided_slice %89 {offsets = [0, 16], sizes = [8, 16], strides = [1, 1]} : vector<8x32xf32> to vector<8x16xf32>
    %116 = tpu.transpose %115, [1, 0] : vector<8x16xf32> -> vector<16x8xf32>
    %cst_41 = arith.constant dense<0.000000e+00> : vector<8x8xf32>
    %117 = tpu.matmul %114, %116, %cst_41 {dimension_numbers = #tpu.dot_dimension_numbers<[1], [0], [0], [1], [0, 0, 1, 1], [], []>} : vector<8x16xf32>, vector<16x8xf32>, vector<8x8xf32> -> vector<8x8xf32>
    %cst_42 = arith.constant 2.500000e-01 : f32
    %118 = vector.broadcast %cst_42 : f32 to vector<8x8xf32>
    %119 = arith.mulf %117, %118 : vector<8x8xf32>
    %120 = vector.broadcast %91 : vector<1x8xf32> to vector<8x8xf32>
    %121 = arith.addf %119, %120 : vector<8x8xf32>
    %cst_43 = arith.constant dense<0xFF800000> : vector<8xf32>
    %122 = vector.multi_reduction <maximumf>, %121, %cst_43 [1] : vector<8x8xf32> to vector<8xf32>
    %123 = vector.shape_cast %122 : vector<8xf32> to vector<8x1xf32>
    %124 = vector.broadcast %123 : vector<8x1xf32> to vector<8x8xf32>
    %125 = arith.subf %121, %124 : vector<8x8xf32>
    %126 = math.exp %125 : vector<8x8xf32>
    %cst_44 = arith.constant dense<0.000000e+00> : vector<8xf32>
    %127 = vector.multi_reduction <add>, %126, %cst_44 [1] : vector<8x8xf32> to vector<8xf32>
    %128 = vector.shape_cast %127 : vector<8xf32> to vector<8x1xf32>
    %129 = tpu.reciprocal %128 {approx = true} : vector<8x1xf32> -> vector<8x1xf32>
    %130 = vector.broadcast %129 : vector<8x1xf32> to vector<8x8xf32>
    %131 = arith.mulf %126, %130 : vector<8x8xf32>
    %132 = vector.extract_strided_slice %90 {offsets = [0, 16], sizes = [8, 16], strides = [1, 1]} : vector<8x32xf32> to vector<8x16xf32>
    %cst_45 = arith.constant dense<0.000000e+00> : vector<8x16xf32>
    %133 = tpu.matmul %131, %132, %cst_45 {dimension_numbers = #tpu.dot_dimension_numbers<[1], [0], [0], [1], [0, 0, 1, 1], [], []>} : vector<8x8xf32>, vector<8x16xf32>, vector<8x16xf32> -> vector<8x16xf32>
    %134 = vector.extract_strided_slice %32 {offsets = [16, 0], sizes = [16, 32], strides = [1, 1]} : vector<32x32xf32> to vector<16x32xf32>
    %cst_46 = arith.constant dense<0.000000e+00> : vector<8x32xf32>
    %135 = tpu.matmul %133, %134, %cst_46 {dimension_numbers = #tpu.dot_dimension_numbers<[1], [0], [0], [1], [0, 0, 1, 1], [], []>} : vector<8x16xf32>, vector<16x32xf32>, vector<8x32xf32> -> vector<8x32xf32>
    %136 = arith.addf %113, %135 : vector<8x32xf32>
    %137 = tpu.concatenate %87, %136 in 0 : vector<8x32xf32>, vector<8x32xf32> -> vector<16x32xf32>
    %c0_47 = arith.constant 0 : index
    %c0_48 = arith.constant 0 : index
    %c0_49 = arith.constant 0 : index
    %138 = vector.load %arg9[%c0_47, %c0_48, %c0_49] : memref<2x1x32xf32, #tpu.memory_space<vmem>>, vector<1x1x32xf32>
    %139 = vector.shape_cast %138 : vector<1x1x32xf32> to vector<1x32xf32>
    %140 = vector.broadcast %139 : vector<1x32xf32> to vector<16x32xf32>
    %141 = arith.addf %137, %140 : vector<16x32xf32>
    %142 = arith.addf %141, %25 : vector<16x32xf32>
    %c0_50 = arith.constant 0 : index
    %c0_51 = arith.constant 0 : index
    %c0_52 = arith.constant 0 : index
    %143 = vector.load %arg10[%c0_50, %c0_51, %c0_52] : memref<2x1x32xf32, #tpu.memory_space<vmem>>, vector<1x1x32xf32>
    %144 = vector.shape_cast %143 : vector<1x1x32xf32> to vector<1x32xf32>
    %c0_53 = arith.constant 0 : index
    %c0_54 = arith.constant 0 : index
    %c0_55 = arith.constant 0 : index
    %145 = vector.load %arg11[%c0_53, %c0_54, %c0_55] : memref<2x1x32xf32, #tpu.memory_space<vmem>>, vector<1x1x32xf32>
    %146 = vector.shape_cast %145 : vector<1x1x32xf32> to vector<1x32xf32>
    %cst_56 = arith.constant dense<0.000000e+00> : vector<16xf32>
    %147 = vector.multi_reduction <add>, %142, %cst_56 [1] : vector<16x32xf32> to vector<16xf32>
    %148 = vector.shape_cast %147 : vector<16xf32> to vector<16x1xf32>
    %cst_57 = arith.constant 3.200000e+01 : f32
    %149 = vector.broadcast %cst_57 : f32 to vector<16x1xf32>
    %150 = arith.divf %148, %149 : vector<16x1xf32>
    %151 = vector.broadcast %150 : vector<16x1xf32> to vector<16x32xf32>
    %152 = arith.subf %142, %151 : vector<16x32xf32>
    %153 = arith.mulf %152, %152 : vector<16x32xf32>
    %cst_58 = arith.constant dense<0.000000e+00> : vector<16xf32>
    %154 = vector.multi_reduction <add>, %153, %cst_58 [1] : vector<16x32xf32> to vector<16xf32>
    %155 = vector.shape_cast %154 : vector<16xf32> to vector<16x1xf32>
    %cst_59 = arith.constant 3.200000e+01 : f32
    %156 = vector.broadcast %cst_59 : f32 to vector<16x1xf32>
    %157 = arith.divf %155, %156 : vector<16x1xf32>
    %cst_60 = arith.constant 9.99999996E-13 : f32
    %158 = vector.broadcast %cst_60 : f32 to vector<16x1xf32>
    %159 = arith.addf %157, %158 : vector<16x1xf32>
    %160 = math.rsqrt %159 : vector<16x1xf32>
    %161 = vector.broadcast %160 : vector<16x1xf32> to vector<16x32xf32>
    %162 = arith.mulf %152, %161 : vector<16x32xf32>
    %163 = vector.broadcast %144 : vector<1x32xf32> to vector<16x32xf32>
    %164 = arith.mulf %162, %163 : vector<16x32xf32>
    %165 = vector.broadcast %146 : vector<1x32xf32> to vector<16x32xf32>
    %166 = arith.addf %164, %165 : vector<16x32xf32>
    %c0_61 = arith.constant 0 : index
    %c0_62 = arith.constant 0 : index
    %c0_63 = arith.constant 0 : index
    %167 = vector.load %arg12[%c0_61, %c0_62, %c0_63] : memref<2x32x64xf32, #tpu.memory_space<vmem>>, vector<1x32x64xf32>
    %168 = vector.shape_cast %167 : vector<1x32x64xf32> to vector<32x64xf32>
    %cst_64 = arith.constant dense<0.000000e+00> : vector<16x64xf32>
    %169 = tpu.matmul %166, %168, %cst_64 {dimension_numbers = #tpu.dot_dimension_numbers<[1], [0], [0], [1], [0, 0, 1, 1], [], []>} : vector<16x32xf32>, vector<32x64xf32>, vector<16x64xf32> -> vector<16x64xf32>
    %c0_65 = arith.constant 0 : index
    %c0_66 = arith.constant 0 : index
    %c0_67 = arith.constant 0 : index
    %170 = vector.load %arg13[%c0_65, %c0_66, %c0_67] : memref<2x1x64xf32, #tpu.memory_space<vmem>>, vector<1x1x64xf32>
    %171 = vector.shape_cast %170 : vector<1x1x64xf32> to vector<1x64xf32>
    %172 = vector.broadcast %171 : vector<1x64xf32> to vector<16x64xf32>
    %173 = arith.addf %169, %172 : vector<16x64xf32>
    %cst_68 = arith.constant 5.000000e-01 : f32
    %174 = vector.broadcast %cst_68 : f32 to vector<16x64xf32>
    %175 = arith.mulf %174, %173 : vector<16x64xf32>
    %cst_69 = arith.constant 0.707106769 : f32
    %176 = vector.broadcast %cst_69 : f32 to vector<16x64xf32>
    %177 = arith.mulf %173, %176 : vector<16x64xf32>
    %178 = math.erf %177 : vector<16x64xf32>
    %cst_70 = arith.constant 1.000000e+00 : f32
    %179 = vector.broadcast %cst_70 : f32 to vector<16x64xf32>
    %180 = arith.addf %179, %178 : vector<16x64xf32>
    %181 = arith.mulf %175, %180 : vector<16x64xf32>
    %c0_71 = arith.constant 0 : index
    %c0_72 = arith.constant 0 : index
    %c0_73 = arith.constant 0 : index
    %182 = vector.load %arg14[%c0_71, %c0_72, %c0_73] : memref<2x64x32xf32, #tpu.memory_space<vmem>>, vector<1x64x32xf32>
    %183 = vector.shape_cast %182 : vector<1x64x32xf32> to vector<64x32xf32>
    %cst_74 = arith.constant dense<0.000000e+00> : vector<16x32xf32>
    %184 = tpu.matmul %181, %183, %cst_74 {dimension_numbers = #tpu.dot_dimension_numbers<[1], [0], [0], [1], [0, 0, 1, 1], [], []>} : vector<16x64xf32>, vector<64x32xf32>, vector<16x32xf32> -> vector<16x32xf32>
    %c0_75 = arith.constant 0 : index
    %c0_76 = arith.constant 0 : index
    %c0_77 = arith.constant 0 : index
    %185 = vector.load %arg15[%c0_75, %c0_76, %c0_77] : memref<2x1x32xf32, #tpu.memory_space<vmem>>, vector<1x1x32xf32>
    %186 = vector.shape_cast %185 : vector<1x1x32xf32> to vector<1x32xf32>
    %187 = vector.broadcast %186 : vector<1x32xf32> to vector<16x32xf32>
    %188 = arith.addf %184, %187 : vector<16x32xf32>
    %189 = arith.addf %188, %166 : vector<16x32xf32>
    %c0_78 = arith.constant 0 : index
    %c0_79 = arith.constant 0 : index
    %c0_80 = arith.constant 0 : index
    %190 = vector.load %arg16[%c0_78, %c0_79, %c0_80] : memref<2x1x32xf32, #tpu.memory_space<vmem>>, vector<1x1x32xf32>
    %191 = vector.shape_cast %190 : vector<1x1x32xf32> to vector<1x32xf32>
    %c0_81 = arith.constant 0 : index
    %c0_82 = arith.constant 0 : index
    %c0_83 = arith.constant 0 : index
    %192 = vector.load %arg17[%c0_81, %c0_82, %c0_83] : memref<2x1x32xf32, #tpu.memory_space<vmem>>, vector<1x1x32xf32>
    %193 = vector.shape_cast %192 : vector<1x1x32xf32> to vector<1x32xf32>
    %cst_84 = arith.constant dense<0.000000e+00> : vector<16xf32>
    %194 = vector.multi_reduction <add>, %189, %cst_84 [1] : vector<16x32xf32> to vector<16xf32>
    %195 = vector.shape_cast %194 : vector<16xf32> to vector<16x1xf32>
    %cst_85 = arith.constant 3.200000e+01 : f32
    %196 = vector.broadcast %cst_85 : f32 to vector<16x1xf32>
    %197 = arith.divf %195, %196 : vector<16x1xf32>
    %198 = vector.broadcast %197 : vector<16x1xf32> to vector<16x32xf32>
    %199 = arith.subf %189, %198 : vector<16x32xf32>
    %200 = arith.mulf %199, %199 : vector<16x32xf32>
    %cst_86 = arith.constant dense<0.000000e+00> : vector<16xf32>
    %201 = vector.multi_reduction <add>, %200, %cst_86 [1] : vector<16x32xf32> to vector<16xf32>
    %202 = vector.shape_cast %201 : vector<16xf32> to vector<16x1xf32>
    %cst_87 = arith.constant 3.200000e+01 : f32
    %203 = vector.broadcast %cst_87 : f32 to vector<16x1xf32>
    %204 = arith.divf %202, %203 : vector<16x1xf32>
    %cst_88 = arith.constant 9.99999996E-13 : f32
    %205 = vector.broadcast %cst_88 : f32 to vector<16x1xf32>
    %206 = arith.addf %204, %205 : vector<16x1xf32>
    %207 = math.rsqrt %206 : vector<16x1xf32>
    %208 = vector.broadcast %207 : vector<16x1xf32> to vector<16x32xf32>
    %209 = arith.mulf %199, %208 : vector<16x32xf32>
    %210 = vector.broadcast %191 : vector<1x32xf32> to vector<16x32xf32>
    %211 = arith.mulf %209, %210 : vector<16x32xf32>
    %212 = vector.broadcast %193 : vector<1x32xf32> to vector<16x32xf32>
    %213 = arith.addf %211, %212 : vector<16x32xf32>
    %c1 = arith.constant 1 : index
    %c0_89 = arith.constant 0 : index
    %c0_90 = arith.constant 0 : index
    %214 = vector.load %arg6[%c1, %c0_89, %c0_90] : memref<2x32x96xf32, #tpu.memory_space<vmem>>, vector<1x32x96xf32>
    %215 = vector.shape_cast %214 : vector<1x32x96xf32> to vector<32x96xf32>
    %c1_91 = arith.constant 1 : index
    %c0_92 = arith.constant 0 : index
    %c0_93 = arith.constant 0 : index
    %216 = vector.load %arg7[%c1_91, %c0_92, %c0_93] : memref<2x1x96xf32, #tpu.memory_space<vmem>>, vector<1x1x96xf32>
    %217 = vector.shape_cast %216 : vector<1x1x96xf32> to vector<1x96xf32>
    %c1_94 = arith.constant 1 : index
    %c0_95 = arith.constant 0 : index
    %c0_96 = arith.constant 0 : index
    %218 = vector.load %arg8[%c1_94, %c0_95, %c0_96] : memref<2x32x32xf32, #tpu.memory_space<vmem>>, vector<1x32x32xf32>
    %219 = vector.shape_cast %218 : vector<1x32x32xf32> to vector<32x32xf32>
    %cst_97 = arith.constant dense<0.000000e+00> : vector<16x96xf32>
    %220 = tpu.matmul %213, %215, %cst_97 {dimension_numbers = #tpu.dot_dimension_numbers<[1], [0], [0], [1], [0, 0, 1, 1], [], []>} : vector<16x32xf32>, vector<32x96xf32>, vector<16x96xf32> -> vector<16x96xf32>
    %221 = vector.broadcast %217 : vector<1x96xf32> to vector<16x96xf32>
    %222 = arith.addf %220, %221 : vector<16x96xf32>
    %223 = vector.extract_strided_slice %222 {offsets = [0, 0], sizes = [16, 32], strides = [1, 1]} : vector<16x96xf32> to vector<16x32xf32>
    %224 = vector.extract_strided_slice %222 {offsets = [0, 32], sizes = [16, 32], strides = [1, 1]} : vector<16x96xf32> to vector<16x32xf32>
    %225 = vector.extract_strided_slice %222 {offsets = [0, 64], sizes = [16, 32], strides = [1, 1]} : vector<16x96xf32> to vector<16x32xf32>
    %226 = vector.extract_strided_slice %223 {offsets = [0, 0], sizes = [8, 32], strides = [1, 1]} : vector<16x32xf32> to vector<8x32xf32>
    %227 = vector.extract_strided_slice %224 {offsets = [0, 0], sizes = [8, 32], strides = [1, 1]} : vector<16x32xf32> to vector<8x32xf32>
    %228 = vector.extract_strided_slice %225 {offsets = [0, 0], sizes = [8, 32], strides = [1, 1]} : vector<16x32xf32> to vector<8x32xf32>
    %229 = vector.extract_strided_slice %26 {offsets = [0, 0], sizes = [1, 8], strides = [1, 1]} : vector<2x8xf32> to vector<1x8xf32>
    %230 = vector.extract_strided_slice %226 {offsets = [0, 0], sizes = [8, 16], strides = [1, 1]} : vector<8x32xf32> to vector<8x16xf32>
    %231 = vector.extract_strided_slice %227 {offsets = [0, 0], sizes = [8, 16], strides = [1, 1]} : vector<8x32xf32> to vector<8x16xf32>
    %232 = tpu.transpose %231, [1, 0] : vector<8x16xf32> -> vector<16x8xf32>
    %cst_98 = arith.constant dense<0.000000e+00> : vector<8x8xf32>
    %233 = tpu.matmul %230, %232, %cst_98 {dimension_numbers = #tpu.dot_dimension_numbers<[1], [0], [0], [1], [0, 0, 1, 1], [], []>} : vector<8x16xf32>, vector<16x8xf32>, vector<8x8xf32> -> vector<8x8xf32>
    %cst_99 = arith.constant 2.500000e-01 : f32
    %234 = vector.broadcast %cst_99 : f32 to vector<8x8xf32>
    %235 = arith.mulf %233, %234 : vector<8x8xf32>
    %236 = vector.broadcast %229 : vector<1x8xf32> to vector<8x8xf32>
    %237 = arith.addf %235, %236 : vector<8x8xf32>
    %cst_100 = arith.constant dense<0xFF800000> : vector<8xf32>
    %238 = vector.multi_reduction <maximumf>, %237, %cst_100 [1] : vector<8x8xf32> to vector<8xf32>
    %239 = vector.shape_cast %238 : vector<8xf32> to vector<8x1xf32>
    %240 = vector.broadcast %239 : vector<8x1xf32> to vector<8x8xf32>
    %241 = arith.subf %237, %240 : vector<8x8xf32>
    %242 = math.exp %241 : vector<8x8xf32>
    %cst_101 = arith.constant dense<0.000000e+00> : vector<8xf32>
    %243 = vector.multi_reduction <add>, %242, %cst_101 [1] : vector<8x8xf32> to vector<8xf32>
    %244 = vector.shape_cast %243 : vector<8xf32> to vector<8x1xf32>
    %245 = tpu.reciprocal %244 {approx = true} : vector<8x1xf32> -> vector<8x1xf32>
    %246 = vector.broadcast %245 : vector<8x1xf32> to vector<8x8xf32>
    %247 = arith.mulf %242, %246 : vector<8x8xf32>
    %248 = vector.extract_strided_slice %228 {offsets = [0, 0], sizes = [8, 16], strides = [1, 1]} : vector<8x32xf32> to vector<8x16xf32>
    %cst_102 = arith.constant dense<0.000000e+00> : vector<8x16xf32>
    %249 = tpu.matmul %247, %248, %cst_102 {dimension_numbers = #tpu.dot_dimension_numbers<[1], [0], [0], [1], [0, 0, 1, 1], [], []>} : vector<8x8xf32>, vector<8x16xf32>, vector<8x16xf32> -> vector<8x16xf32>
    %250 = vector.extract_strided_slice %219 {offsets = [0, 0], sizes = [16, 32], strides = [1, 1]} : vector<32x32xf32> to vector<16x32xf32>
    %cst_103 = arith.constant dense<0.000000e+00> : vector<8x32xf32>
    %251 = tpu.matmul %249, %250, %cst_103 {dimension_numbers = #tpu.dot_dimension_numbers<[1], [0], [0], [1], [0, 0, 1, 1], [], []>} : vector<8x16xf32>, vector<16x32xf32>, vector<8x32xf32> -> vector<8x32xf32>
    %252 = vector.extract_strided_slice %226 {offsets = [0, 16], sizes = [8, 16], strides = [1, 1]} : vector<8x32xf32> to vector<8x16xf32>
    %253 = vector.extract_strided_slice %227 {offsets = [0, 16], sizes = [8, 16], strides = [1, 1]} : vector<8x32xf32> to vector<8x16xf32>
    %254 = tpu.transpose %253, [1, 0] : vector<8x16xf32> -> vector<16x8xf32>
    %cst_104 = arith.constant dense<0.000000e+00> : vector<8x8xf32>
    %255 = tpu.matmul %252, %254, %cst_104 {dimension_numbers = #tpu.dot_dimension_numbers<[1], [0], [0], [1], [0, 0, 1, 1], [], []>} : vector<8x16xf32>, vector<16x8xf32>, vector<8x8xf32> -> vector<8x8xf32>
    %cst_105 = arith.constant 2.500000e-01 : f32
    %256 = vector.broadcast %cst_105 : f32 to vector<8x8xf32>
    %257 = arith.mulf %255, %256 : vector<8x8xf32>
    %258 = vector.broadcast %229 : vector<1x8xf32> to vector<8x8xf32>
    %259 = arith.addf %257, %258 : vector<8x8xf32>
    %cst_106 = arith.constant dense<0xFF800000> : vector<8xf32>
    %260 = vector.multi_reduction <maximumf>, %259, %cst_106 [1] : vector<8x8xf32> to vector<8xf32>
    %261 = vector.shape_cast %260 : vector<8xf32> to vector<8x1xf32>
    %262 = vector.broadcast %261 : vector<8x1xf32> to vector<8x8xf32>
    %263 = arith.subf %259, %262 : vector<8x8xf32>
    %264 = math.exp %263 : vector<8x8xf32>
    %cst_107 = arith.constant dense<0.000000e+00> : vector<8xf32>
    %265 = vector.multi_reduction <add>, %264, %cst_107 [1] : vector<8x8xf32> to vector<8xf32>
    %266 = vector.shape_cast %265 : vector<8xf32> to vector<8x1xf32>
    %267 = tpu.reciprocal %266 {approx = true} : vector<8x1xf32> -> vector<8x1xf32>
    %268 = vector.broadcast %267 : vector<8x1xf32> to vector<8x8xf32>
    %269 = arith.mulf %264, %268 : vector<8x8xf32>
    %270 = vector.extract_strided_slice %228 {offsets = [0, 16], sizes = [8, 16], strides = [1, 1]} : vector<8x32xf32> to vector<8x16xf32>
    %cst_108 = arith.constant dense<0.000000e+00> : vector<8x16xf32>
    %271 = tpu.matmul %269, %270, %cst_108 {dimension_numbers = #tpu.dot_dimension_numbers<[1], [0], [0], [1], [0, 0, 1, 1], [], []>} : vector<8x8xf32>, vector<8x16xf32>, vector<8x16xf32> -> vector<8x16xf32>
    %272 = vector.extract_strided_slice %219 {offsets = [16, 0], sizes = [16, 32], strides = [1, 1]} : vector<32x32xf32> to vector<16x32xf32>
    %cst_109 = arith.constant dense<0.000000e+00> : vector<8x32xf32>
    %273 = tpu.matmul %271, %272, %cst_109 {dimension_numbers = #tpu.dot_dimension_numbers<[1], [0], [0], [1], [0, 0, 1, 1], [], []>} : vector<8x16xf32>, vector<16x32xf32>, vector<8x32xf32> -> vector<8x32xf32>
    %274 = arith.addf %251, %273 : vector<8x32xf32>
    %275 = vector.extract_strided_slice %223 {offsets = [8, 0], sizes = [8, 32], strides = [1, 1]} : vector<16x32xf32> to vector<8x32xf32>
    %276 = vector.extract_strided_slice %224 {offsets = [8, 0], sizes = [8, 32], strides = [1, 1]} : vector<16x32xf32> to vector<8x32xf32>
    %277 = vector.extract_strided_slice %225 {offsets = [8, 0], sizes = [8, 32], strides = [1, 1]} : vector<16x32xf32> to vector<8x32xf32>
    %278 = vector.extract_strided_slice %26 {offsets = [1, 0], sizes = [1, 8], strides = [1, 1]} : vector<2x8xf32> to vector<1x8xf32>
    %279 = vector.extract_strided_slice %275 {offsets = [0, 0], sizes = [8, 16], strides = [1, 1]} : vector<8x32xf32> to vector<8x16xf32>
    %280 = vector.extract_strided_slice %276 {offsets = [0, 0], sizes = [8, 16], strides = [1, 1]} : vector<8x32xf32> to vector<8x16xf32>
    %281 = tpu.transpose %280, [1, 0] : vector<8x16xf32> -> vector<16x8xf32>
    %cst_110 = arith.constant dense<0.000000e+00> : vector<8x8xf32>
    %282 = tpu.matmul %279, %281, %cst_110 {dimension_numbers = #tpu.dot_dimension_numbers<[1], [0], [0], [1], [0, 0, 1, 1], [], []>} : vector<8x16xf32>, vector<16x8xf32>, vector<8x8xf32> -> vector<8x8xf32>
    %cst_111 = arith.constant 2.500000e-01 : f32
    %283 = vector.broadcast %cst_111 : f32 to vector<8x8xf32>
    %284 = arith.mulf %282, %283 : vector<8x8xf32>
    %285 = vector.broadcast %278 : vector<1x8xf32> to vector<8x8xf32>
    %286 = arith.addf %284, %285 : vector<8x8xf32>
    %cst_112 = arith.constant dense<0xFF800000> : vector<8xf32>
    %287 = vector.multi_reduction <maximumf>, %286, %cst_112 [1] : vector<8x8xf32> to vector<8xf32>
    %288 = vector.shape_cast %287 : vector<8xf32> to vector<8x1xf32>
    %289 = vector.broadcast %288 : vector<8x1xf32> to vector<8x8xf32>
    %290 = arith.subf %286, %289 : vector<8x8xf32>
    %291 = math.exp %290 : vector<8x8xf32>
    %cst_113 = arith.constant dense<0.000000e+00> : vector<8xf32>
    %292 = vector.multi_reduction <add>, %291, %cst_113 [1] : vector<8x8xf32> to vector<8xf32>
    %293 = vector.shape_cast %292 : vector<8xf32> to vector<8x1xf32>
    %294 = tpu.reciprocal %293 {approx = true} : vector<8x1xf32> -> vector<8x1xf32>
    %295 = vector.broadcast %294 : vector<8x1xf32> to vector<8x8xf32>
    %296 = arith.mulf %291, %295 : vector<8x8xf32>
    %297 = vector.extract_strided_slice %277 {offsets = [0, 0], sizes = [8, 16], strides = [1, 1]} : vector<8x32xf32> to vector<8x16xf32>
    %cst_114 = arith.constant dense<0.000000e+00> : vector<8x16xf32>
    %298 = tpu.matmul %296, %297, %cst_114 {dimension_numbers = #tpu.dot_dimension_numbers<[1], [0], [0], [1], [0, 0, 1, 1], [], []>} : vector<8x8xf32>, vector<8x16xf32>, vector<8x16xf32> -> vector<8x16xf32>
    %299 = vector.extract_strided_slice %219 {offsets = [0, 0], sizes = [16, 32], strides = [1, 1]} : vector<32x32xf32> to vector<16x32xf32>
    %cst_115 = arith.constant dense<0.000000e+00> : vector<8x32xf32>
    %300 = tpu.matmul %298, %299, %cst_115 {dimension_numbers = #tpu.dot_dimension_numbers<[1], [0], [0], [1], [0, 0, 1, 1], [], []>} : vector<8x16xf32>, vector<16x32xf32>, vector<8x32xf32> -> vector<8x32xf32>
    %301 = vector.extract_strided_slice %275 {offsets = [0, 16], sizes = [8, 16], strides = [1, 1]} : vector<8x32xf32> to vector<8x16xf32>
    %302 = vector.extract_strided_slice %276 {offsets = [0, 16], sizes = [8, 16], strides = [1, 1]} : vector<8x32xf32> to vector<8x16xf32>
    %303 = tpu.transpose %302, [1, 0] : vector<8x16xf32> -> vector<16x8xf32>
    %cst_116 = arith.constant dense<0.000000e+00> : vector<8x8xf32>
    %304 = tpu.matmul %301, %303, %cst_116 {dimension_numbers = #tpu.dot_dimension_numbers<[1], [0], [0], [1], [0, 0, 1, 1], [], []>} : vector<8x16xf32>, vector<16x8xf32>, vector<8x8xf32> -> vector<8x8xf32>
    %cst_117 = arith.constant 2.500000e-01 : f32
    %305 = vector.broadcast %cst_117 : f32 to vector<8x8xf32>
    %306 = arith.mulf %304, %305 : vector<8x8xf32>
    %307 = vector.broadcast %278 : vector<1x8xf32> to vector<8x8xf32>
    %308 = arith.addf %306, %307 : vector<8x8xf32>
    %cst_118 = arith.constant dense<0xFF800000> : vector<8xf32>
    %309 = vector.multi_reduction <maximumf>, %308, %cst_118 [1] : vector<8x8xf32> to vector<8xf32>
    %310 = vector.shape_cast %309 : vector<8xf32> to vector<8x1xf32>
    %311 = vector.broadcast %310 : vector<8x1xf32> to vector<8x8xf32>
    %312 = arith.subf %308, %311 : vector<8x8xf32>
    %313 = math.exp %312 : vector<8x8xf32>
    %cst_119 = arith.constant dense<0.000000e+00> : vector<8xf32>
    %314 = vector.multi_reduction <add>, %313, %cst_119 [1] : vector<8x8xf32> to vector<8xf32>
    %315 = vector.shape_cast %314 : vector<8xf32> to vector<8x1xf32>
    %316 = tpu.reciprocal %315 {approx = true} : vector<8x1xf32> -> vector<8x1xf32>
    %317 = vector.broadcast %316 : vector<8x1xf32> to vector<8x8xf32>
    %318 = arith.mulf %313, %317 : vector<8x8xf32>
    %319 = vector.extract_strided_slice %277 {offsets = [0, 16], sizes = [8, 16], strides = [1, 1]} : vector<8x32xf32> to vector<8x16xf32>
    %cst_120 = arith.constant dense<0.000000e+00> : vector<8x16xf32>
    %320 = tpu.matmul %318, %319, %cst_120 {dimension_numbers = #tpu.dot_dimension_numbers<[1], [0], [0], [1], [0, 0, 1, 1], [], []>} : vector<8x8xf32>, vector<8x16xf32>, vector<8x16xf32> -> vector<8x16xf32>
    %321 = vector.extract_strided_slice %219 {offsets = [16, 0], sizes = [16, 32], strides = [1, 1]} : vector<32x32xf32> to vector<16x32xf32>
    %cst_121 = arith.constant dense<0.000000e+00> : vector<8x32xf32>
    %322 = tpu.matmul %320, %321, %cst_121 {dimension_numbers = #tpu.dot_dimension_numbers<[1], [0], [0], [1], [0, 0, 1, 1], [], []>} : vector<8x16xf32>, vector<16x32xf32>, vector<8x32xf32> -> vector<8x32xf32>
    %323 = arith.addf %300, %322 : vector<8x32xf32>
    %324 = tpu.concatenate %274, %323 in 0 : vector<8x32xf32>, vector<8x32xf32> -> vector<16x32xf32>
    %c1_122 = arith.constant 1 : index
    %c0_123 = arith.constant 0 : index
    %c0_124 = arith.constant 0 : index
    %325 = vector.load %arg9[%c1_122, %c0_123, %c0_124] : memref<2x1x32xf32, #tpu.memory_space<vmem>>, vector<1x1x32xf32>
    %326 = vector.shape_cast %325 : vector<1x1x32xf32> to vector<1x32xf32>
    %327 = vector.broadcast %326 : vector<1x32xf32> to vector<16x32xf32>
    %328 = arith.addf %324, %327 : vector<16x32xf32>
    %329 = arith.addf %328, %213 : vector<16x32xf32>
    %c1_125 = arith.constant 1 : index
    %c0_126 = arith.constant 0 : index
    %c0_127 = arith.constant 0 : index
    %330 = vector.load %arg10[%c1_125, %c0_126, %c0_127] : memref<2x1x32xf32, #tpu.memory_space<vmem>>, vector<1x1x32xf32>
    %331 = vector.shape_cast %330 : vector<1x1x32xf32> to vector<1x32xf32>
    %c1_128 = arith.constant 1 : index
    %c0_129 = arith.constant 0 : index
    %c0_130 = arith.constant 0 : index
    %332 = vector.load %arg11[%c1_128, %c0_129, %c0_130] : memref<2x1x32xf32, #tpu.memory_space<vmem>>, vector<1x1x32xf32>
    %333 = vector.shape_cast %332 : vector<1x1x32xf32> to vector<1x32xf32>
    %cst_131 = arith.constant dense<0.000000e+00> : vector<16xf32>
    %334 = vector.multi_reduction <add>, %329, %cst_131 [1] : vector<16x32xf32> to vector<16xf32>
    %335 = vector.shape_cast %334 : vector<16xf32> to vector<16x1xf32>
    %cst_132 = arith.constant 3.200000e+01 : f32
    %336 = vector.broadcast %cst_132 : f32 to vector<16x1xf32>
    %337 = arith.divf %335, %336 : vector<16x1xf32>
    %338 = vector.broadcast %337 : vector<16x1xf32> to vector<16x32xf32>
    %339 = arith.subf %329, %338 : vector<16x32xf32>
    %340 = arith.mulf %339, %339 : vector<16x32xf32>
    %cst_133 = arith.constant dense<0.000000e+00> : vector<16xf32>
    %341 = vector.multi_reduction <add>, %340, %cst_133 [1] : vector<16x32xf32> to vector<16xf32>
    %342 = vector.shape_cast %341 : vector<16xf32> to vector<16x1xf32>
    %cst_134 = arith.constant 3.200000e+01 : f32
    %343 = vector.broadcast %cst_134 : f32 to vector<16x1xf32>
    %344 = arith.divf %342, %343 : vector<16x1xf32>
    %cst_135 = arith.constant 9.99999996E-13 : f32
    %345 = vector.broadcast %cst_135 : f32 to vector<16x1xf32>
    %346 = arith.addf %344, %345 : vector<16x1xf32>
    %347 = math.rsqrt %346 : vector<16x1xf32>
    %348 = vector.broadcast %347 : vector<16x1xf32> to vector<16x32xf32>
    %349 = arith.mulf %339, %348 : vector<16x32xf32>
    %350 = vector.broadcast %331 : vector<1x32xf32> to vector<16x32xf32>
    %351 = arith.mulf %349, %350 : vector<16x32xf32>
    %352 = vector.broadcast %333 : vector<1x32xf32> to vector<16x32xf32>
    %353 = arith.addf %351, %352 : vector<16x32xf32>
    %c1_136 = arith.constant 1 : index
    %c0_137 = arith.constant 0 : index
    %c0_138 = arith.constant 0 : index
    %354 = vector.load %arg12[%c1_136, %c0_137, %c0_138] : memref<2x32x64xf32, #tpu.memory_space<vmem>>, vector<1x32x64xf32>
    %355 = vector.shape_cast %354 : vector<1x32x64xf32> to vector<32x64xf32>
    %cst_139 = arith.constant dense<0.000000e+00> : vector<16x64xf32>
    %356 = tpu.matmul %353, %355, %cst_139 {dimension_numbers = #tpu.dot_dimension_numbers<[1], [0], [0], [1], [0, 0, 1, 1], [], []>} : vector<16x32xf32>, vector<32x64xf32>, vector<16x64xf32> -> vector<16x64xf32>
    %c1_140 = arith.constant 1 : index
    %c0_141 = arith.constant 0 : index
    %c0_142 = arith.constant 0 : index
    %357 = vector.load %arg13[%c1_140, %c0_141, %c0_142] : memref<2x1x64xf32, #tpu.memory_space<vmem>>, vector<1x1x64xf32>
    %358 = vector.shape_cast %357 : vector<1x1x64xf32> to vector<1x64xf32>
    %359 = vector.broadcast %358 : vector<1x64xf32> to vector<16x64xf32>
    %360 = arith.addf %356, %359 : vector<16x64xf32>
    %cst_143 = arith.constant 5.000000e-01 : f32
    %361 = vector.broadcast %cst_143 : f32 to vector<16x64xf32>
    %362 = arith.mulf %361, %360 : vector<16x64xf32>
    %cst_144 = arith.constant 0.707106769 : f32
    %363 = vector.broadcast %cst_144 : f32 to vector<16x64xf32>
    %364 = arith.mulf %360, %363 : vector<16x64xf32>
    %365 = math.erf %364 : vector<16x64xf32>
    %cst_145 = arith.constant 1.000000e+00 : f32
    %366 = vector.broadcast %cst_145 : f32 to vector<16x64xf32>
    %367 = arith.addf %366, %365 : vector<16x64xf32>
    %368 = arith.mulf %362, %367 : vector<16x64xf32>
    %c1_146 = arith.constant 1 : index
    %c0_147 = arith.constant 0 : index
    %c0_148 = arith.constant 0 : index
    %369 = vector.load %arg14[%c1_146, %c0_147, %c0_148] : memref<2x64x32xf32, #tpu.memory_space<vmem>>, vector<1x64x32xf32>
    %370 = vector.shape_cast %369 : vector<1x64x32xf32> to vector<64x32xf32>
    %cst_149 = arith.constant dense<0.000000e+00> : vector<16x32xf32>
    %371 = tpu.matmul %368, %370, %cst_149 {dimension_numbers = #tpu.dot_dimension_numbers<[1], [0], [0], [1], [0, 0, 1, 1], [], []>} : vector<16x64xf32>, vector<64x32xf32>, vector<16x32xf32> -> vector<16x32xf32>
    %c1_150 = arith.constant 1 : index
    %c0_151 = arith.constant 0 : index
    %c0_152 = arith.constant 0 : index
    %372 = vector.load %arg15[%c1_150, %c0_151, %c0_152] : memref<2x1x32xf32, #tpu.memory_space<vmem>>, vector<1x1x32xf32>
    %373 = vector.shape_cast %372 : vector<1x1x32xf32> to vector<1x32xf32>
    %374 = vector.broadcast %373 : vector<1x32xf32> to vector<16x32xf32>
    %375 = arith.addf %371, %374 : vector<16x32xf32>
    %376 = arith.addf %375, %353 : vector<16x32xf32>
    %c1_153 = arith.constant 1 : index
    %c0_154 = arith.constant 0 : index
    %c0_155 = arith.constant 0 : index
    %377 = vector.load %arg16[%c1_153, %c0_154, %c0_155] : memref<2x1x32xf32, #tpu.memory_space<vmem>>, vector<1x1x32xf32>
    %378 = vector.shape_cast %377 : vector<1x1x32xf32> to vector<1x32xf32>
    %c1_156 = arith.constant 1 : index
    %c0_157 = arith.constant 0 : index
    %c0_158 = arith.constant 0 : index
    %379 = vector.load %arg17[%c1_156, %c0_157, %c0_158] : memref<2x1x32xf32, #tpu.memory_space<vmem>>, vector<1x1x32xf32>
    %380 = vector.shape_cast %379 : vector<1x1x32xf32> to vector<1x32xf32>
    %cst_159 = arith.constant dense<0.000000e+00> : vector<16xf32>
    %381 = vector.multi_reduction <add>, %376, %cst_159 [1] : vector<16x32xf32> to vector<16xf32>
    %382 = vector.shape_cast %381 : vector<16xf32> to vector<16x1xf32>
    %cst_160 = arith.constant 3.200000e+01 : f32
    %383 = vector.broadcast %cst_160 : f32 to vector<16x1xf32>
    %384 = arith.divf %382, %383 : vector<16x1xf32>
    %385 = vector.broadcast %384 : vector<16x1xf32> to vector<16x32xf32>
    %386 = arith.subf %376, %385 : vector<16x32xf32>
    %387 = arith.mulf %386, %386 : vector<16x32xf32>
    %cst_161 = arith.constant dense<0.000000e+00> : vector<16xf32>
    %388 = vector.multi_reduction <add>, %387, %cst_161 [1] : vector<16x32xf32> to vector<16xf32>
    %389 = vector.shape_cast %388 : vector<16xf32> to vector<16x1xf32>
    %cst_162 = arith.constant 3.200000e+01 : f32
    %390 = vector.broadcast %cst_162 : f32 to vector<16x1xf32>
    %391 = arith.divf %389, %390 : vector<16x1xf32>
    %cst_163 = arith.constant 9.99999996E-13 : f32
    %392 = vector.broadcast %cst_163 : f32 to vector<16x1xf32>
    %393 = arith.addf %391, %392 : vector<16x1xf32>
    %394 = math.rsqrt %393 : vector<16x1xf32>
    %395 = vector.broadcast %394 : vector<16x1xf32> to vector<16x32xf32>
    %396 = arith.mulf %386, %395 : vector<16x32xf32>
    %397 = vector.broadcast %378 : vector<1x32xf32> to vector<16x32xf32>
    %398 = arith.mulf %396, %397 : vector<16x32xf32>
    %399 = vector.broadcast %380 : vector<1x32xf32> to vector<16x32xf32>
    %400 = arith.addf %398, %399 : vector<16x32xf32>
    %c0_164 = arith.constant 0 : index
    %c0_165 = arith.constant 0 : index
    %401 = vector.load %arg25[%c0_164, %c0_165] : memref<16x32xf32, #tpu.memory_space<vmem>>, vector<16x32xf32>
    tpu.vector_store %arg25[%c0_164, %c0_165], %400 {strides = array<i32>} : memref<16x32xf32, #tpu.memory_space<vmem>>, vector<16x32xf32>,
    %c0_166 = arith.constant 0 : index
    %c0_167 = arith.constant 0 : index
    %402 = vector.load %arg18[%c0_166, %c0_167] : memref<32x32xf32, #tpu.memory_space<vmem>>, vector<32x32xf32>
    %cst_168 = arith.constant dense<0.000000e+00> : vector<16x32xf32>
    %403 = tpu.matmul %400, %402, %cst_168 {dimension_numbers = #tpu.dot_dimension_numbers<[1], [0], [0], [1], [0, 0, 1, 1], [], []>} : vector<16x32xf32>, vector<32x32xf32>, vector<16x32xf32> -> vector<16x32xf32>
    %c0_169 = arith.constant 0 : index
    %c0_170 = arith.constant 0 : index
    %404 = vector.load %arg19[%c0_169, %c0_170] : memref<1x32xf32, #tpu.memory_space<vmem>>, vector<1x32xf32>
    %405 = vector.broadcast %404 : vector<1x32xf32> to vector<16x32xf32>
    %406 = arith.addf %403, %405 : vector<16x32xf32>
    %cst_171 = arith.constant 5.000000e-01 : f32
    %407 = vector.broadcast %cst_171 : f32 to vector<16x32xf32>
    %408 = arith.mulf %407, %406 : vector<16x32xf32>
    %cst_172 = arith.constant 0.707106769 : f32
    %409 = vector.broadcast %cst_172 : f32 to vector<16x32xf32>
    %410 = arith.mulf %406, %409 : vector<16x32xf32>
    %411 = math.erf %410 : vector<16x32xf32>
    %cst_173 = arith.constant 1.000000e+00 : f32
    %412 = vector.broadcast %cst_173 : f32 to vector<16x32xf32>
    %413 = arith.addf %412, %411 : vector<16x32xf32>
    %414 = arith.mulf %408, %413 : vector<16x32xf32>
    %c0_174 = arith.constant 0 : index
    %c0_175 = arith.constant 0 : index
    %415 = vector.load %arg20[%c0_174, %c0_175] : memref<1x32xf32, #tpu.memory_space<vmem>>, vector<1x32xf32>
    %c0_176 = arith.constant 0 : index
    %c0_177 = arith.constant 0 : index
    %416 = vector.load %arg21[%c0_176, %c0_177] : memref<1x32xf32, #tpu.memory_space<vmem>>, vector<1x32xf32>
    %cst_178 = arith.constant dense<0.000000e+00> : vector<16xf32>
    %417 = vector.multi_reduction <add>, %414, %cst_178 [1] : vector<16x32xf32> to vector<16xf32>
    %418 = vector.shape_cast %417 : vector<16xf32> to vector<16x1xf32>
    %cst_179 = arith.constant 3.200000e+01 : f32
    %419 = vector.broadcast %cst_179 : f32 to vector<16x1xf32>
    %420 = arith.divf %418, %419 : vector<16x1xf32>
    %421 = vector.broadcast %420 : vector<16x1xf32> to vector<16x32xf32>
    %422 = arith.subf %414, %421 : vector<16x32xf32>
    %423 = arith.mulf %422, %422 : vector<16x32xf32>
    %cst_180 = arith.constant dense<0.000000e+00> : vector<16xf32>
    %424 = vector.multi_reduction <add>, %423, %cst_180 [1] : vector<16x32xf32> to vector<16xf32>
    %425 = vector.shape_cast %424 : vector<16xf32> to vector<16x1xf32>
    %cst_181 = arith.constant 3.200000e+01 : f32
    %426 = vector.broadcast %cst_181 : f32 to vector<16x1xf32>
    %427 = arith.divf %425, %426 : vector<16x1xf32>
    %cst_182 = arith.constant 9.99999996E-13 : f32
    %428 = vector.broadcast %cst_182 : f32 to vector<16x1xf32>
    %429 = arith.addf %427, %428 : vector<16x1xf32>
    %430 = math.rsqrt %429 : vector<16x1xf32>
    %431 = vector.broadcast %430 : vector<16x1xf32> to vector<16x32xf32>
    %432 = arith.mulf %422, %431 : vector<16x32xf32>
    %433 = vector.broadcast %415 : vector<1x32xf32> to vector<16x32xf32>
    %434 = arith.mulf %432, %433 : vector<16x32xf32>
    %435 = vector.broadcast %416 : vector<1x32xf32> to vector<16x32xf32>
    %436 = arith.addf %434, %435 : vector<16x32xf32>
    %c0_183 = arith.constant 0 : index
    %c0_184 = arith.constant 0 : index
    %437 = vector.load %arg22[%c0_183, %c0_184] : memref<32x128xf32, #tpu.memory_space<vmem>>, vector<32x128xf32>
    %cst_185 = arith.constant dense<0.000000e+00> : vector<16x128xf32>
    %438 = tpu.matmul %436, %437, %cst_185 {dimension_numbers = #tpu.dot_dimension_numbers<[1], [0], [0], [1], [0, 0, 1, 1], [], []>} : vector<16x32xf32>, vector<32x128xf32>, vector<16x128xf32> -> vector<16x128xf32>
    %c0_186 = arith.constant 0 : index
    %c0_187 = arith.constant 0 : index
    %439 = vector.load %arg23[%c0_186, %c0_187] : memref<1x128xf32, #tpu.memory_space<vmem>>, vector<1x128xf32>
    %440 = vector.broadcast %439 : vector<1x128xf32> to vector<16x128xf32>
    %441 = arith.addf %438, %440 : vector<16x128xf32>
    %c0_188 = arith.constant 0 : index
    %c0_189 = arith.constant 0 : index
    %442 = vector.load %arg24[%c0_188, %c0_189] : memref<16x128xf32, #tpu.memory_space<vmem>>, vector<16x128xf32>
    tpu.vector_store %arg24[%c0_188, %c0_189], %441 {strides = array<i32>} : memref<16x128xf32, #tpu.memory_space<vmem>>, vector<16x128xf32>,
    return
  }
  func.func @transform_0(%arg0: i32) -> (i32, i32) {
    %c0_i32 = arith.constant 0 : i32
    %c0_i32_0 = arith.constant 0 : i32
    %c0_i32_1 = arith.constant 0 : i32
    return %c0_i32, %c0_i32_0 : i32, i32
  }
  func.func @transform_1(%arg0: i32) -> (i32, i32) {
    %c0_i32 = arith.constant 0 : i32
    %c0_i32_0 = arith.constant 0 : i32
    %c0_i32_1 = arith.constant 0 : i32
    return %c0_i32, %c0_i32_0 : i32, i32
  }
  func.func @transform_2(%arg0: i32) -> (i32, i32) {
    %c0_i32 = arith.constant 0 : i32
    %c0_i32_0 = arith.constant 0 : i32
    %c0_i32_1 = arith.constant 0 : i32
    return %c0_i32, %c0_i32_0 : i32, i32
  }
  func.func @transform_3(%arg0: i32) -> (i32, i32) {
    %c0_i32 = arith.constant 0 : i32
    %c0_i32_0 = arith.constant 0 : i32
    %c0_i32_1 = arith.constant 0 : i32
    return %c0_i32, %c0_i32_0 : i32, i32
  }
  func.func @transform_4(%arg0: i32) -> (i32, i32) {
    %c0_i32 = arith.constant 0 : i32
    %c0_i32_0 = arith.constant 0 : i32
    %c0_i32_1 = arith.constant 0 : i32
    return %c0_i32, %c0_i32_0 : i32, i32
  }
  func.func @transform_5(%arg0: i32) -> (i32, i32, i32) {
    %c0_i32 = arith.constant 0 : i32
    %c0_i32_0 = arith.constant 0 : i32
    %c0_i32_1 = arith.constant 0 : i32
    %c0_i32_2 = arith.constant 0 : i32
    return %c0_i32, %c0_i32_0, %c0_i32_1 : i32, i32, i32
  }
  func.func @transform_6(%arg0: i32) -> (i32, i32, i32) {
    %c0_i32 = arith.constant 0 : i32
    %c0_i32_0 = arith.constant 0 : i32
    %c0_i32_1 = arith.constant 0 : i32
    %c0_i32_2 = arith.constant 0 : i32
    return %c0_i32, %c0_i32_0, %c0_i32_1 : i32, i32, i32
  }
  func.func @transform_7(%arg0: i32) -> (i32, i32, i32) {
    %c0_i32 = arith.constant 0 : i32
    %c0_i32_0 = arith.constant 0 : i32
    %c0_i32_1 = arith.constant 0 : i32
    %c0_i32_2 = arith.constant 0 : i32
    return %c0_i32, %c0_i32_0, %c0_i32_1 : i32, i32, i32
  }
  func.func @transform_8(%arg0: i32) -> (i32, i32, i32) {
    %c0_i32 = arith.constant 0 : i32
    %c0_i32_0 = arith.constant 0 : i32
    %c0_i32_1 = arith.constant 0 : i32
    %c0_i32_2 = arith.constant 0 : i32
    return %c0_i32, %c0_i32_0, %c0_i32_1 : i32, i32, i32
  }
  func.func @transform_9(%arg0: i32) -> (i32, i32, i32) {
    %c0_i32 = arith.constant 0 : i32
    %c0_i32_0 = arith.constant 0 : i32
    %c0_i32_1 = arith.constant 0 : i32
    %c0_i32_2 = arith.constant 0 : i32
    return %c0_i32, %c0_i32_0, %c0_i32_1 : i32, i32, i32
  }
  func.func @transform_10(%arg0: i32) -> (i32, i32, i32) {
    %c0_i32 = arith.constant 0 : i32
    %c0_i32_0 = arith.constant 0 : i32
    %c0_i32_1 = arith.constant 0 : i32
    %c0_i32_2 = arith.constant 0 : i32
    return %c0_i32, %c0_i32_0, %c0_i32_1 : i32, i32, i32
  }
  func.func @transform_11(%arg0: i32) -> (i32, i32, i32) {
    %c0_i32 = arith.constant 0 : i32
    %c0_i32_0 = arith.constant 0 : i32
    %c0_i32_1 = arith.constant 0 : i32
    %c0_i32_2 = arith.constant 0 : i32
    return %c0_i32, %c0_i32_0, %c0_i32_1 : i32, i32, i32
  }
  func.func @transform_12(%arg0: i32) -> (i32, i32, i32) {
    %c0_i32 = arith.constant 0 : i32
    %c0_i32_0 = arith.constant 0 : i32
    %c0_i32_1 = arith.constant 0 : i32
    %c0_i32_2 = arith.constant 0 : i32
    return %c0_i32, %c0_i32_0, %c0_i32_1 : i32, i32, i32
  }
  func.func @transform_13(%arg0: i32) -> (i32, i32, i32) {
    %c0_i32 = arith.constant 0 : i32
    %c0_i32_0 = arith.constant 0 : i32
    %c0_i32_1 = arith.constant 0 : i32
    %c0_i32_2 = arith.constant 0 : i32
    return %c0_i32, %c0_i32_0, %c0_i32_1 : i32, i32, i32
  }
  func.func @transform_14(%arg0: i32) -> (i32, i32, i32) {
    %c0_i32 = arith.constant 0 : i32
    %c0_i32_0 = arith.constant 0 : i32
    %c0_i32_1 = arith.constant 0 : i32
    %c0_i32_2 = arith.constant 0 : i32
    return %c0_i32, %c0_i32_0, %c0_i32_1 : i32, i32, i32
  }
  func.func @transform_15(%arg0: i32) -> (i32, i32, i32) {
    %c0_i32 = arith.constant 0 : i32
    %c0_i32_0 = arith.constant 0 : i32
    %c0_i32_1 = arith.constant 0 : i32
    %c0_i32_2 = arith.constant 0 : i32
    return %c0_i32, %c0_i32_0, %c0_i32_1 : i32, i32, i32
  }
  func.func @transform_16(%arg0: i32) -> (i32, i32, i32) {
    %c0_i32 = arith.constant 0 : i32
    %c0_i32_0 = arith.constant 0 : i32
    %c0_i32_1 = arith.constant 0 : i32
    %c0_i32_2 = arith.constant 0 : i32
    return %c0_i32, %c0_i32_0, %c0_i32_1 : i32, i32, i32
  }
  func.func @transform_17(%arg0: i32) -> (i32, i32) {
    %c0_i32 = arith.constant 0 : i32
    %c0_i32_0 = arith.constant 0 : i32
    %c0_i32_1 = arith.constant 0 : i32
    return %c0_i32, %c0_i32_0 : i32, i32
  }
  func.func @transform_18(%arg0: i32) -> (i32, i32) {
    %c0_i32 = arith.constant 0 : i32
    %c0_i32_0 = arith.constant 0 : i32
    %c0_i32_1 = arith.constant 0 : i32
    return %c0_i32, %c0_i32_0 : i32, i32
  }
  func.func @transform_19(%arg0: i32) -> (i32, i32) {
    %c0_i32 = arith.constant 0 : i32
    %c0_i32_0 = arith.constant 0 : i32
    %c0_i32_1 = arith.constant 0 : i32
    return %c0_i32, %c0_i32_0 : i32, i32
  }
  func.func @transform_20(%arg0: i32) -> (i32, i32) {
    %c0_i32 = arith.constant 0 : i32
    %c0_i32_0 = arith.constant 0 : i32
    %c0_i32_1 = arith.constant 0 : i32
    return %c0_i32, %c0_i32_0 : i32, i32
  }
  func.func @transform_21(%arg0: i32) -> (i32, i32) {
    %c0_i32 = arith.constant 0 : i32
    %c0_i32_0 = arith.constant 0 : i32
    %c0_i32_1 = arith.constant 0 : i32
    return %c0_i32, %c0_i32_0 : i32, i32
  }
  func.func @transform_22(%arg0: i32) -> (i32, i32) {
    %c0_i32 = arith.constant 0 : i32
    %c0_i32_0 = arith.constant 0 : i32
    %c0_i32_1 = arith.constant 0 : i32
    return %c0_i32, %c0_i32_0 : i32, i32
  }
  func.func @transform_23(%arg0: i32) -> (i32, i32) {
    %c0_i32 = arith.constant 0 : i32
    %c0_i32_0 = arith.constant 0 : i32
    %c0_i32_1 = arith.constant 0 : i32
    return %c0_i32, %c0_i32_0 : i32, i32
  }
  func.func @transform_24(%arg0: i32) -> (i32, i32) {
    %c0_i32 = arith.constant 0 : i32
    %c0_i32_0 = arith.constant 0 : i32
    %c0_i32_1 = arith.constant 0 : i32
    return %c0_i32, %c0_i32_0 : i32, i32
  }
}

</mosaic_0001>

<bundles_post_ra>
// kernel: tpu_custom_call.1
= control target key start
LH: loop header
LB: loop body
LE: loop exit
PB: predicated region body
PF: predicated region fallthrough
CT: control target
= control target key end

     0   :  { %s4916_s0 = inlined_call_operand.hbm [shape: f32[16,32], index: 0, kind: input, shape index: {}]   ;;  %s4917_s1 = inlined_call_operand.hbm [shape: f32[8,32], index: 1, kind: input, shape index: {}]   ;;  %s4918_s2 = inlined_call_operand.hbm [shape: f32[2,8], index: 2, kind: input, shape index: {}]   ;;  %s4919_s3 = inlined_call_operand.hbm [shape: f32[1,32], index: 3, kind: input, shape index: {}]   ;;  %s4920_s4 = inlined_call_operand.hbm [shape: f32[1,32], index: 4, kind: input, shape index: {}]   ;;  %s4921_s5 = inlined_call_operand.vmem [shape: f32[2,32,96], index: 5, kind: input, shape index: {}]   ;;  %s4922_s6 = inlined_call_operand.hbm [shape: f32[2,1,96], index: 6, kind: input, shape index: {}]   ;;  %s4923_s7 = inlined_call_operand.vmem [shape: f32[2,32,32], index: 7, kind: input, shape index: {}]   ;;  %s4924_s8 = inlined_call_operand.hbm [shape: f32[2,1,32], index: 8, kind: input, shape index: {}]   ;;  %s4925_s9 = inlined_call_operand.hbm [shape: f32[2,1,32], index: 9, kind: input, shape index: {}]   ;;  %s4926_s10 = inlined_call_operand.hbm [shape: f32[2,1,32], index: 10, kind: input, shape index: {}]   ;;  %s4927_s11 = inlined_call_operand.vmem [shape: f32[2,32,64], index: 11, kind: input, shape index: {}]   ;;  %s4928_s12 = inlined_call_operand.hbm [shape: f32[2,1,64], index: 12, kind: input, shape index: {}]   ;;  %s4929_s13 = inlined_call_operand.vmem [shape: f32[2,64,32], index: 13, kind: input, shape index: {}]   ;;  %s4930_s14 = inlined_call_operand.hbm [shape: f32[2,1,32], index: 14, kind: input, shape index: {}]   ;;  %s4931_s15 = inlined_call_operand.hbm [shape: f32[2,1,32], index: 15, kind: input, shape index: {}]   ;;  %s4932_s16 = inlined_call_operand.hbm [shape: f32[2,1,32], index: 16, kind: input, shape index: {}]   ;;  %s4933_s17 = inlined_call_operand.hbm [shape: f32[32,32], index: 17, kind: input, shape index: {}]   ;;  %s4934_s18 = inlined_call_operand.hbm [shape: f32[1,32], index: 18, kind: input, shape index: {}]   ;;  %s4935_s19 = inlined_call_operand.hbm [shape: f32[1,32], index: 19, kind: input, shape index: {}]   ;;  %s4936_s20 = inlined_call_operand.vmem [shape: f32[1,32], index: 20, kind: input, shape index: {}]   ;;  %s4937_s21 = inlined_call_operand.vmem [shape: f32[32,128], index: 21, kind: input, shape index: {}]   ;;  %s4938_s22 = inlined_call_operand.vmem [shape: f32[1,128], index: 22, kind: input, shape index: {}]   ;;  %s4939_s23 = inlined_call_operand.hbm [shape: f32[16,128], index: 23, kind: output, shape index: {0}]   ;;  %s4940_s24 = inlined_call_operand.hbm [shape: f32[16,32], index: 24, kind: output, shape index: {1}]  }
   0x1   :  { %4943 = sst [smem:[#allocation42_spill]] %s4916_s0 }
   0x2   :  { %4944 = sst [smem:[#allocation43_spill]] %s4917_s1 }
   0x3   :  { %4945 = sst [smem:[#allocation44_spill]] %s4918_s2 }
   0x4   :  { %4946 = sst [smem:[#allocation45_spill]] %s4919_s3 }
   0x5   :  { %4947 = sst [smem:[#allocation46_spill]] %s4920_s4 }
   0x6   :  { %4948 = sst [smem:[#allocation47_spill]] %s4921_s5 }
   0x7   :  { %4949 = sst [smem:[#allocation48_spill]] %s4922_s6 }
   0x8   :  { %4950 = sst [smem:[#allocation49_spill]] %s4923_s7 }
   0x9   :  { %4951 = sst [smem:[#allocation50_spill]] %s4924_s8 }
   0xa   :  { %30 = vsyncpa [#allocation3], 0 }
   0xb   :  { %31 = vsyncpa [#allocation6], 0 }
   0xc   :  { %32 = vsyncpa [#allocation9], 0 }
   0xd   :  { %33 = vsyncpa [#allocation12], 0 }
   0xe   :  { %34 = vsyncpa [#allocation15], 0 }
   0xf   :  { %35 = vsyncpa [#allocation18], 0 }
  0x10   :  { %36 = vsyncpa [#allocation21], 0 }
  0x11   :  { %37 = vsyncpa [#allocation24], 0 }
  0x12   :  { %38 = vsyncpa [#allocation27], 0 }
  0x13   :  { %39 = vsyncpa [#allocation4], 0 }
  0x14   :  { %40 = vsyncpa [#allocation30], 0  ;;  %s4268_s5 = smov [#allocation5]   ;;  %s4269_s27 = smov [#allocation8]  }
  0x15   :  { %s59_s26 = sshll.u32 %s4268_s5, 4  ;;  %s79_s28 = sshll.u32 %s4269_s27, 4  ;;  %s60_s26 = int_to_ptr.vmem [resolvable:$true] %s59_s26  ;;  %s80_s28 = int_to_ptr.vmem [resolvable:$true] %s79_s28 }
  0x16   :  { %s3894_s6 = scalar_lea.vmem %s60_s26, 128  ;;  %p3899_p1 = scmp.lt.s32.totalorder %s60_s26, %s60_s26 }
  0x17   :  { %p3895_p0 = scmp.ne.s32.totalorder %s60_s26, %s3894_s6  ;;  %p3900_p2 = scmp.lt.s32.totalorder %s3894_s6, %s3894_s6 }
  0x19   :  { %p3901_p3 = por %p3900_p2, %p3899_p1 }
  0x1b   :  { %p3902_p4 = pnand %p3901_p3, %p3895_p0 }
  0x1d   :  { %3905 = shalt.err (!%p3902_p4)
}
  0x1e   :  { %s4952_s0 = sld [smem:[#allocation43_spill]]  ;;  %s3914_s7 = scalar_lea.vmem %s80_s28, 16 }
  0x1f   :  { %p3915_p5 = scmp.ne.s32.totalorder %s80_s28, %s3914_s7  ;;  %s3918_s30 = scalar_lea.vmem %s80_s28, 32 }
  0x20   :  { %p3919_p6 = scmp.lt.s32.totalorder %s80_s28, %s80_s28  ;;  %p3920_p7 = scmp.lt.s32.totalorder %s3918_s30, %s3914_s7 }
  0x22   :  { %p3921_p8 = por %p3920_p7, %p3919_p6 }
  0x24   :  { %62 = dma.hbm_to_vmem [thread:$0]  %s4952_s0, 128, %s60_s26, [#allocation6]  }
  0x25   :  { %p3922_p9 = pnand %p3921_p8, %p3915_p5 }
  0x27   :  { %3925 = shalt.err (!%p3922_p9)
}
  0x28   :  { %s4953_s8 = sld [smem:[#allocation45_spill]]  ;;  %s4270_s4 = smov [#allocation11]  }
  0x29   :  { %s100_s1 = sshll.u32 %s4270_s4, 4  ;;  %s101_s1 = int_to_ptr.vmem [resolvable:$true] %s100_s1 }
  0x2a   :  { %s3934_s5 = scalar_lea.vmem %s101_s1, 32  ;;  %p3939_p11 = scmp.lt.s32.totalorder %s101_s1, %s101_s1 }
  0x2b   :  { %p3935_p10 = scmp.ne.s32.totalorder %s101_s1, %s3934_s5  ;;  %p3940_p12 = scmp.lt.s32.totalorder %s3934_s5, %s3934_s5 }
  0x2d   :  { %p3941_p13 = por %p3940_p12, %p3939_p11 }
  0x2e   :  { %82 = dma.hbm_to_vmem [thread:$0]  %s4953_s8, 16, %s80_s28, [#allocation9]  }
  0x2f   :  { %p3942_p0 = pnand %p3941_p13, %p3935_p10 }
  0x31   :  { %3945 = shalt.err (!%p3942_p0)
}
  0x32   :  { %s4271_s26 = smov 16   ;;  %s4272_s27 = smov 1  }
  0x33   :  { %s4954_s29 = sld [smem:[#allocation48_spill]]  ;;  %s4273_s28 = smov [#allocation14]  }
  0x34   :  { %s126_s0 = sshll.u32 %s4273_s28, 4  ;;  %s4274_s7 = smov [#allocation17]   ;;  %s127_s0 = int_to_ptr.vmem [resolvable:$true] %s126_s0 }
  0x35   :  { %s152_s30 = sshll.u32 %s4274_s7, 4  ;;  %s3954_s3 = scalar_lea.vmem %s127_s0, 32  ;;  %s153_s30 = int_to_ptr.vmem [resolvable:$true] %s152_s30 }
  0x36   :  { %p3955_p1 = scmp.ne.s32.totalorder %s127_s0, %s3954_s3  ;;  %p3959_p2 = scmp.lt.s32.totalorder %s127_s0, %s127_s0 }
  0x37   :  { %p3960_p3 = scmp.lt.s32.totalorder %s3954_s3, %s3954_s3 }
  0x39   :  { %106 = dma.hbm_to_vmem [thread:$0]  %s4954_s29, 32, %s101_s1, [#allocation12], %s4271_s26, %s4271_s26, %s4272_s27  }
  0x3a   :  { %p3961_p4 = por %p3960_p3, %p3959_p2 }
  0x3c   :  { %p3962_p5 = pnand %p3961_p4, %p3955_p1 }
  0x3e   :  { %3965 = shalt.err (!%p3962_p5)
}
  0x3f   :  { %132 = dma.hbm_to_vmem [thread:$0]  %s4925_s9, 32, %s127_s0, [#allocation15], %s4271_s26, %s4271_s26, %s4272_s27  }
  0x40   :  { %s3974_s4 = scalar_lea.vmem %s153_s30, 32  ;;  %p3979_p7 = scmp.lt.s32.totalorder %s153_s30, %s153_s30 }
  0x41   :  { %p3975_p6 = scmp.ne.s32.totalorder %s153_s30, %s3974_s4  ;;  %p3980_p8 = scmp.lt.s32.totalorder %s3974_s4, %s3974_s4 }
  0x43   :  { %p3981_p9 = por %p3980_p8, %p3979_p7 }
  0x45   :  { %p3982_p10 = pnand %p3981_p9, %p3975_p6 }
  0x47   :  { %3985 = shalt.err (!%p3982_p10)
}
  0x48   :  { %158 = dma.hbm_to_vmem [thread:$0]  %s4928_s12, 32, %s153_s30, [#allocation18], %s4271_s26, %s4271_s26, %s4272_s27  }
  0x49   :  { %s4275_s6 = smov [#allocation20]  }
  0x4a   :  { %s178_s2 = sshll.u32 %s4275_s6, 4  ;;  %s179_s2 = int_to_ptr.vmem [resolvable:$true] %s178_s2 }
  0x4b   :  { %s3994_s29 = scalar_lea.vmem %s179_s2, 32  ;;  %p3999_p12 = scmp.lt.s32.totalorder %s179_s2, %s179_s2 }
  0x4c   :  { %p3995_p11 = scmp.ne.s32.totalorder %s179_s2, %s3994_s29  ;;  %p4000_p13 = scmp.lt.s32.totalorder %s3994_s29, %s3994_s29 }
  0x4e   :  { %p4001_p0 = por %p4000_p13, %p3999_p12 }
  0x50   :  { %p4002_p1 = pnand %p4001_p0, %p3995_p11 }
  0x52   :  { %4005 = shalt.err (!%p4002_p1)
}
  0x53   :  { %184 = dma.hbm_to_vmem [thread:$0]  %s4931_s15, 32, %s179_s2, [#allocation21], %s4271_s26, %s4271_s26, %s4272_s27  }
  0x54   :  { %s4276_s0 = smov [#allocation23]   ;;  %s4277_s12 = smov [#allocation2]  }
  0x55   :  { %s202_s7 = sshll.u32 %s4276_s0, 4  ;;  %s46_s30 = sshll.u32 %s4277_s12, 4  ;;  %s203_s7 = int_to_ptr.vmem [resolvable:$true] %s202_s7  ;;  %s47_s30 = int_to_ptr.vmem [resolvable:$true] %s46_s30 }
  0x56   :  { %s4014_s3 = scalar_lea.vmem %s203_s7, 512  ;;  %p4019_p3 = scmp.lt.s32.totalorder %s203_s7, %s203_s7 }
  0x57   :  { %p4015_p2 = scmp.ne.s32.totalorder %s203_s7, %s4014_s3  ;;  %p4020_p4 = scmp.lt.s32.totalorder %s4014_s3, %s4014_s3 }
  0x59   :  { %p4021_p5 = por %p4020_p4, %p4019_p3 }
  0x5b   :  { %p4022_p6 = pnand %p4021_p5, %p4015_p2 }
  0x5d   :  { %4025 = shalt.err (!%p4022_p6)
}
  0x5e   :  { %s4278_s25 = smov 128   ;;  %s4279_s8 = smov 8  }
  0x5f   :  { %208 = dma.hbm_to_vmem [thread:$0]  %s4933_s17, 512, %s203_s7, [#allocation24], %s4278_s25, %s4278_s25, %s4279_s8  }
  0x60   :  { %s4034_s1 = scalar_lea.vmem %s47_s30, 256  ;;  %p4039_p8 = scmp.lt.s32.totalorder %s47_s30, %s47_s30 }
  0x61   :  { %p4035_p7 = scmp.ne.s32.totalorder %s47_s30, %s4034_s1  ;;  %p4040_p9 = scmp.lt.s32.totalorder %s4034_s1, %s4034_s1 }
  0x63   :  { %p4041_p10 = por %p4040_p9, %p4039_p8 }
  0x65   :  { %p4042_p11 = pnand %p4041_p10, %p4035_p7 }
  0x67   :  { %4045 = shalt.err (!%p4042_p11)
}
  0x68   :  { %s4955_s2 = sld [smem:[#allocation42_spill]]  ;;  %s4280_s29 = smov [#allocation7]  }
  0x69   :  { %s69_s9 = sshll.u32 %s4280_s29, 4  ;;  %s4281_s28 = smov [#allocation10]   ;;  %s70_s9 = int_to_ptr.vmem [resolvable:$true] %s69_s9 }
  0x6a   :  { %s89_s0 = sshll.u32 %s4281_s28, 4  ;;  %s4054_s17 = scalar_lea.vmem %s70_s9, 32  ;;  %s90_s0 = int_to_ptr.vmem [resolvable:$true] %s89_s0 }
  0x6b   :  { %p4055_p12 = scmp.ne.s32.totalorder %s70_s9, %s4054_s17  ;;  %p4059_p13 = scmp.lt.s32.totalorder %s70_s9, %s70_s9 }
  0x6c   :  { %p4060_p0 = scmp.lt.s32.totalorder %s4054_s17, %s4054_s17 }
  0x6e   :  { %52 = dma.hbm_to_vmem [thread:$0]  %s4955_s2, 256, %s47_s30, [#allocation3], %s4278_s25, %s4278_s25, %s4279_s8  }
  0x6f   :  { %p4061_p1 = por %p4060_p0, %p4059_p13 }
  0x71   :  { %p4062_p2 = pnand %p4061_p1, %p4055_p12 }
  0x73   :  { %4065 = shalt.err (!%p4062_p2)
}
  0x74   :  { %s4956_s3 = sld [smem:[#allocation44_spill]]  ;;  %s4074_s4 = scalar_lea.vmem %s90_s0, 16 }
  0x75   :  { %p4075_p3 = scmp.ne.s32.totalorder %s90_s0, %s4074_s4  ;;  %s4078_s30 = scalar_lea.vmem %s90_s0, 32 }
  0x76   :  { %p4079_p4 = scmp.lt.s32.totalorder %s90_s0, %s90_s0  ;;  %p4080_p5 = scmp.lt.s32.totalorder %s4078_s30, %s4074_s4 }
  0x78   :  { %p4081_p6 = por %p4080_p5, %p4079_p4 }
  0x7a   :  { %72 = dma.hbm_to_vmem [thread:$0]  %s4956_s3, 32, %s70_s9, [#allocation6]  }
  0x7b   :  { %p4082_p7 = pnand %p4081_p6, %p4075_p3 }
  0x7d   :  { %4085 = shalt.err (!%p4082_p7)
}
  0x7e   :  { %s4957_s5 = sld [smem:[#allocation46_spill]]  ;;  %s4282_s6 = smov [#allocation13]  }
  0x7f   :  { %s114_s2 = sshll.u32 %s4282_s6, 4  ;;  %s4283_s29 = smov [#allocation16]   ;;  %s115_s2 = int_to_ptr.vmem [resolvable:$true] %s114_s2 }
  0x80   :  { %s138_s28 = sshll.u32 %s4283_s29, 4  ;;  %s4094_s17 = scalar_lea.vmem %s115_s2, 32  ;;  %s139_s28 = int_to_ptr.vmem [resolvable:$true] %s138_s28 }
  0x81   :  { %p4095_p8 = scmp.ne.s32.totalorder %s115_s2, %s4094_s17  ;;  %p4099_p9 = scmp.lt.s32.totalorder %s115_s2, %s115_s2 }
  0x82   :  { %p4100_p10 = scmp.lt.s32.totalorder %s4094_s17, %s4094_s17 }
  0x84   :  { %92 = dma.hbm_to_vmem [thread:$0]  %s4957_s5, 16, %s90_s0, [#allocation9]  }
  0x85   :  { %p4101_p11 = por %p4100_p10, %p4099_p9 }
  0x87   :  { %p4102_p12 = pnand %p4101_p11, %p4095_p8 }
  0x89   :  { %4105 = shalt.err (!%p4102_p12)
}
  0x8a   :  { %s4958_s12 = sld [smem:[#allocation50_spill]]  ;;  %s4114_s0 = scalar_lea.vmem %s139_s28, 32 }
  0x8b   :  { %p4115_p13 = scmp.ne.s32.totalorder %s139_s28, %s4114_s0  ;;  %p4119_p0 = scmp.lt.s32.totalorder %s139_s28, %s139_s28 }
  0x8c   :  { %p4120_p1 = scmp.lt.s32.totalorder %s4114_s0, %s4114_s0 }
  0x8e   :  { %p4121_p2 = por %p4120_p1, %p4119_p0 }
  0x90   :  { %120 = dma.hbm_to_vmem [thread:$0]  %s4958_s12, 32, %s115_s2, [#allocation12], %s4271_s26, %s4271_s26, %s4272_s27  }
  0x91   :  { %p4122_p3 = pnand %p4121_p2, %p4115_p13 }
  0x93   :  { %4125 = shalt.err (!%p4122_p3)
}
  0x94   :  { %144 = dma.hbm_to_vmem [thread:$0]  %s4926_s10, 32, %s139_s28, [#allocation15], %s4271_s26, %s4271_s26, %s4272_s27  }
  0x95   :  { %s4284_s30 = smov [#allocation19]   ;;  %s4285_s1 = smov [#allocation22]  }
  0x96   :  { %s166_s15 = sshll.u32 %s4284_s30, 4  ;;  %s190_s5 = sshll.u32 %s4285_s1, 4  ;;  %s167_s15 = int_to_ptr.vmem [resolvable:$true] %s166_s15  ;;  %s191_s5 = int_to_ptr.vmem [resolvable:$true] %s190_s5 }
  0x97   :  { %s4134_s6 = scalar_lea.vmem %s167_s15, 32  ;;  %p4139_p5 = scmp.lt.s32.totalorder %s167_s15, %s167_s15 }
  0x98   :  { %p4135_p4 = scmp.ne.s32.totalorder %s167_s15, %s4134_s6  ;;  %p4140_p6 = scmp.lt.s32.totalorder %s4134_s6, %s4134_s6 }
  0x9a   :  { %p4141_p7 = por %p4140_p6, %p4139_p5 }
  0x9c   :  { %p4142_p8 = pnand %p4141_p7, %p4135_p4 }
  0x9e   :  { %4145 = shalt.err (!%p4142_p8)
}
  0x9f   :  { %172 = dma.hbm_to_vmem [thread:$0]  %s4930_s14, 32, %s167_s15, [#allocation18], %s4271_s26, %s4271_s26, %s4272_s27  }
  0xa0   :  { %s4154_s10 = scalar_lea.vmem %s191_s5, 32  ;;  %p4159_p10 = scmp.lt.s32.totalorder %s191_s5, %s191_s5 }
  0xa1   :  { %p4155_p9 = scmp.ne.s32.totalorder %s191_s5, %s4154_s10  ;;  %p4160_p11 = scmp.lt.s32.totalorder %s4154_s10, %s4154_s10 }
  0xa3   :  { %p4161_p12 = por %p4160_p11, %p4159_p10 }
  0xa5   :  { %p4162_p13 = pnand %p4161_p12, %p4155_p9 }
  0xa7   :  { %4165 = shalt.err (!%p4162_p13)
}
  0xa8   :  { %196 = dma.hbm_to_vmem [thread:$0]  %s4932_s16, 32, %s191_s5, [#allocation21], %s4271_s26, %s4271_s26, %s4272_s27  }
  0xa9   :  { %s4286_s9 = smov [#allocation25]   ;;  %s4287_s12 = smov [#allocation26]  }
  0xaa   :  { %s215_s7 = sshll.u32 %s4286_s9, 4  ;;  %s225_s0 = sshll.u32 %s4287_s12, 4  ;;  %s216_s7 = int_to_ptr.vmem [resolvable:$true] %s215_s7  ;;  %s226_s0 = int_to_ptr.vmem [resolvable:$true] %s225_s0 }
  0xab   :  { %s4174_s14 = scalar_lea.vmem %s216_s7, 16  ;;  %s4178_s3 = scalar_lea.vmem %s216_s7, 32 }
  0xac   :  { %p4175_p0 = scmp.ne.s32.totalorder %s216_s7, %s4174_s14  ;;  %p4179_p1 = scmp.lt.s32.totalorder %s216_s7, %s216_s7 }
  0xad   :  { %p4180_p2 = scmp.lt.s32.totalorder %s4178_s3, %s4174_s14 }
  0xaf   :  { %p4181_p3 = por %p4180_p2, %p4179_p1 }
  0xb1   :  { %p4182_p4 = pnand %p4181_p3, %p4175_p0 }
  0xb3   :  { %4185 = shalt.err (!%p4182_p4)
}
  0xb4   :  { %218 = dma.hbm_to_vmem [thread:$0]  %s4934_s18, 16, %s216_s7, [#allocation24]  }
  0xb5   :  { %s4194_s15 = scalar_lea.vmem %s226_s0, 16  ;;  %s4198_s16 = scalar_lea.vmem %s226_s0, 32 }
  0xb6   :  { %p4195_p5 = scmp.ne.s32.totalorder %s226_s0, %s4194_s15  ;;  %p4199_p6 = scmp.lt.s32.totalorder %s226_s0, %s226_s0 }
  0xb7   :  { %p4200_p7 = scmp.lt.s32.totalorder %s4198_s16, %s4194_s15 }
  0xb9   :  { %p4201_p8 = por %p4200_p7, %p4199_p6 }
  0xbb   :  { %p4202_p9 = pnand %p4201_p8, %p4195_p5 }
  0xbd   :  { %4205 = shalt.err (!%p4202_p9)
}
  0xbe   :  { %228 = dma.hbm_to_vmem [thread:$0]  %s4935_s19, 16, %s226_s0, [#allocation27]  }
  0xbf   :  { %4246 = dma.done.wait [#allocation3], 256  }
  0xc0   :  { %4247 = vsyncadd [#allocation3], 4294967040 }
  0xc1   :  { %4248 = dma.done.wait [#allocation6], 160  }
  0xc2   :  { %4249 = vsyncadd [#allocation6], 4294967136 }
  0xc3   :  { %4250 = dma.done.wait [#allocation9], 32  }
  0xc4   :  { %4251 = vsyncadd [#allocation9], 4294967264 }
  0xc5   :  { %4252 = dma.done.wait [#allocation12], 64  }
  0xc6   :  { %4253 = vsyncadd [#allocation12], 4294967232 }
  0xc7   :  { %4254 = dma.done.wait [#allocation15], 64  }
  0xc8   :  { %4255 = vsyncadd [#allocation15], 4294967232 }
  0xc9   :  { %4256 = dma.done.wait [#allocation18], 64  }
  0xca   :  { %4257 = vsyncadd [#allocation18], 4294967232 }
  0xcb   :  { %4258 = dma.done.wait [#allocation21], 64  }
  0xcc   :  { %4259 = vsyncadd [#allocation21], 4294967232 }
  0xcd   :  { %4260 = dma.done.wait [#allocation24], 528  }
  0xce   :  { %4261 = vsyncadd [#allocation24], 4294966768 }
  0xcf   :  { %4262 = dma.done.wait [#allocation27], 16  }
  0xd0   :  { %4263 = vsyncadd [#allocation27], 4294967280  ;;  %v283_v0 = vld [vmem:[#allocation5] sm:$0xff]  ;;  %v284_v1 = vld [vmem:[#allocation2] sm:$0xff]  ;;  %vm290_vm0 = vcmask 261120   ;;  %s4959_s1 = sld [smem:[#allocation47_spill]]  ;;  %v510_v44 = vlaneseq }
  0xd1   :  { %v285_v2 = vld [vmem:[#allocation2 + $0x8] sm:$0xff]  ;;  %v286_v3 = vadd.f32 %v284_v1, %v283_v0  ;;  %v3347_v28 = vld [vmem:[#allocation8] ss:$0 sm:$0xff]  ;;  %v3348_v30 = vld [vmem:[#allocation10] ss:$0 sm:$0xff]  ;;  %v4288_v37 = vmov 0.0  }
  0xd2   :  { %v287_v4 = vadd.f32 %v285_v2, %v283_v0  ;;  %3560 = vmatprep.subr.mxu1 %v4288_v37  ;;  %vm4289_vm1 = vmmov 0   ;;  %v3349_v38 = vld [vmem:[#allocation11] ss:$0 sm:$0xff]  ;;  %s4290_s17 = smov 96   ;;  %s4291_s9 = smov 80   ;;  %vm434_vm2 = vcmask 130048  }
  0xd3   :  { %v291_v5 = vsel %vm290_vm0, %v286_v3, 0.0  ;;  %3562 = vmatprep.mubr.msk.f32.mxu1 %vm4289_vm1, %v4288_v37  ;;  %v4539_v45 = vshrl.u32 %v510_v44, 7  ;;  %v4542_v47 = vld [vmem:[#allocation7] sm:$0x3]  ;;  %vm515_vm3 = vcmask 64512   ;;  %s4292_s7 = smov 64  }
  0xd4   :  { %292 = vadd.xlane.f32.xlu0 %v291_v5  ;;  %v294_v6 = vsel %vm290_vm0, %v287_v4, 0.0  ;;  %s4293_s12 = smov 112   ;;  %s4294_s0 = smov 48   ;;  %vm1571_vm4 = vcmask 523264  }
  0xd5   :  { %v512_v46 = vsub.s32 0, %v4539_v45  ;;  %s4960_s4 = sld [smem:[#allocation49_spill]]  ;;  %s4295_s26 = smov [#allocation29]  }
  0xd6   :  { %v338_v17 = vld [vmem:[%s4959_s1 + $0x18] sm:$0xff]  ;;  %v337_v18 = vld [vmem:[%s4959_s1 + $0x10] sm:$0xff]  ;;  %v336_v19 = vld [vmem:[%s4959_s1 + $0x8] sm:$0xff] }
  0xd7   :  { %3549 = vmatprep.subr.mxu0 %v338_v17  ;;  %v335_v20 = vld [vmem:[%s4959_s1] sm:$0xff]  ;;  %v4545_v48 = vrot.slane %v4542_v47, %v512_v46 }
  0xd8   :  { %295 = vadd.xlane.f32.xlu0 %v294_v6  ;;  %3550 = vmatpush3.msra.mxu0 %v338_v17 }
  0xd9   :  { %3551 = vmatprep.subr.mxu0 %v337_v18 }
  0xda   :  { %3552 = vmatpush3.msra.mxu0 %v337_v18 }
  0xdb   :  { %3553 = vmatprep.subr.mxu0 %v336_v19 }
  0xdc   :  { %3554 = vmatpush3.msra.mxu0 %v336_v19  ;;  %v4583_v19 = vld [vmem:[%s4960_s4 + $0x8] sm:$0xff] }
  0xdd   :  { %3555 = vmatprep.subr.mxu0 %v335_v20 }
  0xde   :  { %3556 = vmatpush3.msra.mxu0 %v335_v20  ;;  %v4589_v20 = vld [vmem:[%s4960_s4] sm:$0xff] }
  0xdf   :  { %3580 = vmatprep.subr.mxu0 %v4288_v37 }
 0x15d   :  { %v293_v7 = vpop.xlane.xlu0 %292 }
 0x15e   :  { %v298_v8 = vmul.f32 0.03125, %v293_v7 }
 0x160   :  { %v300_v9 = vsub.f32 %v286_v3, %v298_v8 }
 0x161   :  { %v296_v10 = vpop.xlane.xlu0 %295 }
 0x162   :  { %v299_v11 = vmul.f32 0.03125, %v296_v10  ;;  %v302_v12 = vmul.f32 %v300_v9, %v300_v9 }
 0x164   :  { %v301_v13 = vsub.f32 %v287_v4, %v299_v11  ;;  %v304_v14 = vsel %vm290_vm0, %v302_v12, 0.0 }
 0x165   :  { %305 = vadd.xlane.f32.xlu1 %v304_v14  ;;  %v343_v14 = vld [vmem:[%s4960_s4 + $0x18] sm:$0xff] }
 0x166   :  { %v303_v15 = vmul.f32 %v301_v13, %v301_v13 }
 0x168   :  { %v307_v16 = vsel %vm290_vm0, %v303_v15, 0.0  ;;  %v342_v15 = vld [vmem:[%s4960_s4 + $0x10] sm:$0xff] }
 0x169   :  { %308 = vadd.xlane.f32.xlu1 %v307_v16 }
 0x1ee   :  { %v306_v21 = vpop.xlane.xlu1 %305 }
 0x1ef   :  { %v310_v22 = vmul.f32 0.03125, %v306_v21 }
 0x1f1   :  { %v312_v23 = vadd.f32 1e-12, %v310_v22 }
 0x1f2   :  { %v309_v24 = vpop.xlane.xlu1 %308 }
 0x1f3   :  { %3818 = vrsqrt.f32 %v312_v23  ;;  %v311_v25 = vmul.f32 0.03125, %v309_v24 }
 0x1f5   :  { %v313_v26 = vadd.f32 1e-12, %v311_v25 }
 0x1f7   :  { %3820 = vrsqrt.f32 %v313_v26 }
 0x200   :  { %v3819_v27 = vpop.eup %3818 }
 0x201   :  { %v316_v29 = vmul.f32 %v3819_v27, %v300_v9 }
 0x203   :  { %v324_v31 = vmul.f32 %v3347_v28, %v316_v29 }
 0x204   :  { %v3821_v32 = vpop.eup %3820 }
 0x205   :  { %v317_v33 = vmul.f32 %v3821_v32, %v301_v13  ;;  %v4516_v34 = vadd.f32 %v3348_v30, %v324_v31 }
 0x207   :  { %v325_v35 = vmul.f32 %v3347_v28, %v317_v33  ;;  %3557 = vmatprep.mubr.msk.f32.mxu0 %vm290_vm0, %v4516_v34  ;;  %v996_v28 = vsub.s32 1, %v4539_v45 }
 0x209   :  { %v4520_v36 = vadd.f32 %v3348_v30, %v325_v35  ;;  %v4617_v31 = vrot.slane %v4542_v47, %v996_v28  ;;  %v3368_v47 = vld [vmem:[#allocation13] ss:$0 sm:$0xff] }
 0x20b   :  { %3558 = vmatmul.mubr.msk.f32.vlgmr.msra.gmra.mxu0 %vm290_vm0, %v4520_v36 }
 0x20c   :  { %3584 = vmatprep.mubr.msk.f32.mxu0 %vm4289_vm1, %v4288_v37  ;;  %3581 = vmatpush3.msra.mxu0 %v343_v14 }
 0x20d   :  { %3582 = vmatprep.subr.mxu0 %v4288_v37 }
 0x20e   :  { %3583 = vmatpush3.msra.mxu0 %v342_v15 }
 0x20f   :  { %3594 = vmatprep.subr.mxu0 %v4288_v37 }
 0x2cb   :  { %v3559_v39 = vpop.f32.mrf.mxu0 }
 0x2cc   :  { %v4530_v40 = vadd.f32 %v3559_v39, %v3349_v38 }
 0x2cd   :  { %v422_v41 = vpop.f32.mrf.mxu0 }
 0x2ce   :  { %v423_v42 = vadd.f32 %v3349_v38, %v422_v41 }
 0x2d0   :  { %432 = vrot.lane.b32.xlu0 %v423_v42, %s4290_s17 }
 0x2d4   :  { %605 = vrot.lane.b32.xlu0 %v423_v42, %s4291_s9 }
 0x342   :  { %v433_v43 = vpop.permute.xlu0 %432 }
 0x343   :  { %3561 = vmatpush3.xpose.msk.msra.mxu1 %vm434_vm2, %v433_v43 }
 0x344   :  { %3565 = vmatprep.subr.mxu1 %v4288_v37 }
 0x346   :  { %3563 = vmatmul.mubr.msk.f32.vlgmr.msra.gmra.mxu1 %vm434_vm2, %v423_v42  ;;  %v606_v63 = vpop.permute.xlu0 %605 }
 0x347   :  { %3567 = vmatprep.mubr.msk.f32.mxu1 %vm4289_vm1, %v4288_v37 }
 0x406   :  { %v505_v49 = vpop.f32.mrf.mxu1 }
 0x407   :  { %v509_v50 = vmul.f32 0.25, %v505_v49 }
 0x408   :  { %v3564_v51 = vpop.f32.mrf.mxu1 }
 0x409   :  { %v514_v52 = vadd.f32 %v4545_v48, %v509_v50 }
 0x40b   :  { %v516_v53 = vsel %vm515_vm3, %v514_v52, -inf }
 0x40c   :  { %517 = vmax.xlane.f32.xlu1 %v516_v53 }
 0x41d   :  { %527 = vrot.lane.b32.xlu1 %v423_v42, %s4292_s7 }
 0x495   :  { %v518_v54 = vpop.xlane.xlu1 %517 }
 0x496   :  { %v519_v55 = vsub.f32 %v514_v52, %v518_v54 }
 0x498   :  { %v520_v56 = vmul.f32 1.442695, %v519_v55 }
 0x499   :  { %v528_v57 = vpop.permute.xlu1 %527 }
 0x49a   :  { %3822 = vpow2.f32 %v520_v56  ;;  %3566 = vmatpush3.msra.mxu1 %v528_v57 }
 0x49b   :  { %3570 = vmatprep.subr.mxu1 %v4288_v37 }
 0x4a7   :  { %v3823_v58 = vpop.eup %3822 }
 0x4a8   :  { %v522_v59 = vsel %vm515_vm3, %v3823_v58, 0.0 }
 0x4a9   :  { %523 = vadd.xlane.f32.xlu1 %v522_v59 }
 0x4ba   :  { %603 = vrot.lane.b32.xlu1 %v423_v42, %s4293_s12 }
 0x532   :  { %v524_v60 = vpop.xlane.xlu1 %523 }
 0x533   :  { %3824 = vrcp.f32 %v524_v60 }
 0x536   :  { %v604_v0 = vpop.permute.xlu1 %603 }
 0x540   :  { %v3825_v61 = vpop.eup %3824 }
 0x541   :  { %v526_v62 = vmul.f32 %v3825_v61, %v3823_v58 }
 0x543   :  { %3568 = vmatmul.mubr.msk.f32.vlgmr.msra.gmra.mxu1 %vm515_vm3, %v526_v62 }
 0x544   :  { %3571 = vmatpush3.xpose.msk.msra.mxu1 %vm434_vm2, %v606_v63  ;;  %3572 = vmatprep.mubr.msk.f32.mxu1 %vm4289_vm1, %v4288_v37 }
 0x545   :  { %3575 = vmatprep.subr.mxu1 %v4288_v37 }
 0x547   :  { %3573 = vmatmul.mubr.msk.f32.vlgmr.msra.gmra.mxu1 %vm434_vm2, %v604_v0 }
 0x548   :  { %3577 = vmatprep.mubr.msk.f32.mxu1 %vm4289_vm1, %v4288_v37 }
 0x603   :  { %v599_v1 = vpop.f32.mrf.mxu1 }
 0x605   :  { %v3569_v2 = vpop.f32.mrf.mxu1 }
 0x607   :  { %v677_v3 = vpop.f32.mrf.mxu1 }
 0x608   :  { %v681_v4 = vmul.f32 0.25, %v677_v3 }
 0x609   :  { %v3574_v5 = vpop.f32.mrf.mxu1 }
 0x60a   :  { %v682_v6 = vadd.f32 %v681_v4, %v4545_v48 }
 0x60c   :  { %v683_v7 = vsel %vm515_vm3, %v682_v6, -inf }
 0x60d   :  { %684 = vmax.xlane.f32.xlu0 %v683_v7 }
 0x623   :  { %694 = vrot.lane.b32.xlu0 %v423_v42, %s4294_s0 }
 0x627   :  { %1088 = vrot.lane.b32.xlu0 %v4530_v40, %s4291_s9 }
 0x696   :  { %v685_v8 = vpop.xlane.xlu0 %684 }
 0x697   :  { %v686_v9 = vsub.f32 %v682_v6, %v685_v8 }
 0x699   :  { %v687_v10 = vmul.f32 1.442695, %v686_v9 }
 0x69a   :  { %v695_v11 = vpop.permute.xlu0 %694 }
 0x69b   :  { %3826 = vpow2.f32 %v687_v10  ;;  %3576 = vmatpush3.msra.mxu1 %v695_v11 }
 0x69c   :  { %3587 = vmatprep.subr.mxu1 %v4288_v37 }
 0x69e   :  { %v1089_v25 = vpop.permute.xlu0 %1088 }
 0x6a8   :  { %v3827_v12 = vpop.eup %3826 }
 0x6a9   :  { %v689_v13 = vsel %vm515_vm3, %v3827_v12, 0.0 }
 0x6aa   :  { %690 = vadd.xlane.f32.xlu1 %v689_v13 }
 0x6bb   :  { %917 = vrot.lane.b32.xlu1 %v4530_v40, %s4290_s17 }
 0x6bf   :  { %1086 = vrot.lane.b32.xlu1 %v4530_v40, %s4293_s12 }
 0x733   :  { %v691_v16 = vpop.xlane.xlu1 %690 }
 0x734   :  { %3828 = vrcp.f32 %v691_v16 }
 0x737   :  { %v918_v22 = vpop.permute.xlu1 %917 }
 0x73b   :  { %v1087_v27 = vpop.permute.xlu1 %1086 }
 0x741   :  { %v3829_v17 = vpop.eup %3828 }
 0x742   :  { %v693_v18 = vmul.f32 %v3829_v17, %v3827_v12 }
 0x744   :  { %3578 = vmatmul.mubr.msk.f32.vlgmr.msra.gmra.mxu1 %vm515_vm3, %v693_v18 }
 0x745   :  { %3588 = vmatpush3.msra.mxu1 %v4583_v19  ;;  %3591 = vmatprep.mubr.msk.f32.mxu1 %vm4289_vm1, %v4288_v37 }
 0x746   :  { %3589 = vmatprep.subr.mxu1 %v4288_v37 }
 0x747   :  { %3590 = vmatpush3.msra.mxu1 %v4589_v20 }
 0x748   :  { %3592 = vmatmul.mubr.msk.f32.vlgmr.msra.gmra.mxu1 %vm434_vm2, %v599_v1  ;;  %3599 = vmatprep.subr.mxu1 %v4288_v37 }
 0x749   :  { %3601 = vmatprep.mubr.msk.f32.mxu1 %vm4289_vm1, %v4288_v37 }
 0x804   :  { %v766_v21 = vpop.f32.mrf.mxu1 }
 0x805   :  { %3585 = vmatmul.mubr.msk.f32.vlgmr.msra.gmra.mxu0 %vm434_vm2, %v766_v21 }
 0x806   :  { %3595 = vmatpush3.xpose.msk.msra.mxu0 %vm434_vm2, %v918_v22  ;;  %v3579_v23 = vpop.f32.mrf.mxu1  ;;  %3596 = vmatprep.mubr.msk.f32.mxu0 %vm4289_vm1, %v4288_v37 }
 0x807   :  { %3604 = vmatprep.subr.mxu0 %v4288_v37 }
 0x808   :  { %v912_v24 = vpop.f32.mrf.mxu1 }
 0x809   :  { %3597 = vmatmul.mubr.msk.f32.vlgmr.msra.gmra.mxu0 %vm434_vm2, %v4530_v40 }
 0x80a   :  { %3605 = vmatpush3.xpose.msk.msra.mxu0 %vm434_vm2, %v1089_v25  ;;  %v3593_v26 = vpop.f32.mrf.mxu1  ;;  %3606 = vmatprep.mubr.msk.f32.mxu0 %vm4289_vm1, %v4288_v37 }
 0x80b   :  { %3614 = vmatprep.subr.mxu0 %v4288_v37 }
 0x80d   :  { %3607 = vmatmul.mubr.msk.f32.vlgmr.msra.gmra.mxu0 %vm434_vm2, %v1087_v27 }
 0x80e   :  { %3615 = vmatpush3.msra.mxu0 %v343_v14  ;;  %3618 = vmatprep.mubr.msk.f32.mxu0 %vm4289_vm1, %v4288_v37 }
 0x80f   :  { %3616 = vmatprep.subr.mxu0 %v4288_v37 }
 0x810   :  { %3617 = vmatpush3.msra.mxu0 %v342_v15 }
 0x8c5   :  { %v839_v29 = vpop.f32.mrf.mxu0 }
 0x8c6   :  { %v913_v46 = vadd.f32 %v912_v24, %v839_v29 }
 0x8c7   :  { %v3586_v30 = vpop.f32.mrf.mxu0 }
 0x8c8   :  { %v1406_v49 = vadd.f32 %v3368_v47, %v913_v46 }
 0x8c9   :  { %v989_v32 = vpop.f32.mrf.mxu0 }
 0x8ca   :  { %v993_v33 = vmul.f32 0.25, %v989_v32  ;;  %v1408_v50 = vadd.f32 %v1406_v49, %v4516_v34  ;;  %v3370_v32 = vld [vmem:[#allocation16] ss:$0 sm:$0xff] }
 0x8cb   :  { %v3598_v35 = vpop.f32.mrf.mxu0 }
 0x8cc   :  { %v998_v38 = vadd.f32 %v4617_v31, %v993_v33  ;;  %v1412_v51 = vsel %vm290_vm0, %v1408_v50, 0.0 }
 0x8cd   :  { %v1160_v39 = vpop.f32.mrf.mxu0 }
 0x8ce   :  { %v1164_v41 = vmul.f32 0.25, %v1160_v39  ;;  %v999_v42 = vsel %vm515_vm3, %v998_v38, -inf  ;;  %v1456_v39 = vld [vmem:[%s4927_s11 + $0x10] sm:$0xff] }
 0x8cf   :  { %1000 = vmax.xlane.f32.xlu0 %v999_v42  ;;  %v3608_v43 = vpop.f32.mrf.mxu0  ;;  %v1454_v42 = vld [vmem:[%s4927_s11] sm:$0xff] }
 0x8d0   :  { %v1165_v44 = vadd.f32 %v1164_v41, %v4617_v31  ;;  %v1455_v41 = vld [vmem:[%s4927_s11 + $0x8] sm:$0xff] }
 0x8d2   :  { %v1166_v45 = vsel %vm515_vm3, %v1165_v44, -inf }
 0x8d3   :  { %1167 = vmax.xlane.f32.xlu1 %v1166_v45 }
 0x8e4   :  { %1177 = vrot.lane.b32.xlu1 %v4530_v40, %s4294_s0 }
 0x908   :  { %1413 = vadd.xlane.f32.xlu1 %v1412_v51  ;;  %v1563_v51 = vld [vmem:[%s4929_s13 + $0x38] sm:$0xff] }
 0x958   :  { %v1001_v52 = vpop.xlane.xlu0 %1000 }
 0x959   :  { %v1002_v53 = vsub.f32 %v998_v38, %v1001_v52  ;;  %v1457_v38 = vld [vmem:[%s4927_s11 + $0x18] sm:$0xff]  ;;  %v1562_v52 = vld [vmem:[%s4929_s13 + $0x30] sm:$0xff] }
 0x95a   :  { %3628 = vmatprep.subr.mxu0 %v1457_v38 }
 0x95b   :  { %v1003_v54 = vmul.f32 1.442695, %v1002_v53  ;;  %v1561_v53 = vld [vmem:[%s4929_s13 + $0x28] sm:$0xff] }
 0x95c   :  { %v1168_v55 = vpop.xlane.xlu1 %1167 }
 0x95d   :  { %3830 = vpow2.f32 %v1003_v54  ;;  %v1169_v56 = vsub.f32 %v1165_v44, %v1168_v55  ;;  %v1560_v54 = vld [vmem:[%s4929_s13 + $0x20] sm:$0xff]  ;;  %v1559_v55 = vld [vmem:[%s4929_s13 + $0x18] sm:$0xff] }
 0x95f   :  { %v1170_v57 = vmul.f32 1.442695, %v1169_v56  ;;  %v1558_v56 = vld [vmem:[%s4929_s13 + $0x10] sm:$0xff] }
 0x960   :  { %v1178_v2 = vpop.permute.xlu1 %1177 }
 0x961   :  { %3832 = vpow2.f32 %v1170_v57  ;;  %v1557_v57 = vld [vmem:[%s4929_s13 + $0x8] sm:$0xff] }
 0x96a   :  { %v3831_v58 = vpop.eup %3830 }
 0x96b   :  { %v1005_v59 = vsel %vm515_vm3, %v3831_v58, 0.0 }
 0x96c   :  { %1006 = vadd.xlane.f32.xlu0 %v1005_v59  ;;  %v3371_v59 = vld [vmem:[#allocation17] ss:$0 sm:$0xff] }
 0x96e   :  { %v3833_v60 = vpop.eup %3832 }
 0x96f   :  { %v1172_v61 = vsel %vm515_vm3, %v3833_v60, 0.0 }
 0x970   :  { %1173 = vadd.xlane.f32.xlu0 %v1172_v61 }
 0x986   :  { %1010 = vrot.lane.b32.xlu0 %v4530_v40, %s4292_s7 }
 0x991   :  { %v1414_v8 = vpop.xlane.xlu1 %1413 }
 0x992   :  { %v1418_v11 = vmul.f32 0.03125, %v1414_v8  ;;  %v3374_v8 = vld [vmem:[#allocation19] ss:$0 sm:$0xff] }
 0x994   :  { %v1420_v15 = vsub.f32 %v1408_v50, %v1418_v11 }
 0x9f5   :  { %v1007_v34 = vpop.xlane.xlu0 %1006 }
 0x9f6   :  { %3834 = vrcp.f32 %v1007_v34 }
 0x9f9   :  { %v1174_v62 = vpop.xlane.xlu0 %1173 }
 0x9fa   :  { %3836 = vrcp.f32 %v1174_v62 }
 0x9fd   :  { %v1011_v63 = vpop.permute.xlu0 %1010 }
 0x9fe   :  { %3600 = vmatpush3.msra.mxu1 %v1011_v63 }
 0x9ff   :  { %3609 = vmatprep.subr.mxu1 %v4288_v37 }
 0xa03   :  { %v3835_v0 = vpop.eup %3834 }
 0xa04   :  { %v1009_v1 = vmul.f32 %v3835_v0, %v3831_v58  ;;  %v1556_v58 = vld [vmem:[%s4929_s13] sm:$0xff] }
 0xa06   :  { %3602 = vmatmul.mubr.msk.f32.vlgmr.msra.gmra.mxu1 %vm515_vm3, %v1009_v1 }
 0xa07   :  { %v3837_v3 = vpop.eup %3836  ;;  %3610 = vmatpush3.msra.mxu1 %v1178_v2  ;;  %3611 = vmatprep.mubr.msk.f32.mxu1 %vm4289_vm1, %v4288_v37 }
 0xa08   :  { %v1176_v4 = vmul.f32 %v3837_v3, %v3833_v60  ;;  %3621 = vmatprep.subr.mxu1 %v4288_v37 }
 0xa0a   :  { %3612 = vmatmul.mubr.msk.f32.vlgmr.msra.gmra.mxu1 %vm515_vm3, %v1176_v4 }
 0xa0b   :  { %3622 = vmatpush3.msra.mxu1 %v4583_v19  ;;  %3625 = vmatprep.mubr.msk.f32.mxu1 %vm4289_vm1, %v4288_v37  ;;  %v1422_v19 = vmul.f32 %v1420_v15, %v1420_v15 }
 0xa0c   :  { %3623 = vmatprep.subr.mxu1 %v4288_v37 }
 0xa0d   :  { %3624 = vmatpush3.msra.mxu1 %v4589_v20  ;;  %v1424_v20 = vsel %vm290_vm0, %v1422_v19, 0.0 }
 0xa0e   :  { %3639 = vmatprep.subr.mxu1 %v1563_v51 }
 0xac6   :  { %v1082_v40 = vpop.f32.mrf.mxu1 }
 0xac7   :  { %3626 = vmatmul.mubr.msk.f32.vlgmr.msra.gmra.mxu1 %vm434_vm2, %v1082_v40 }
 0xac8   :  { %v3603_v5 = vpop.f32.mrf.mxu1  ;;  %3640 = vmatpush3.msra.mxu1 %v1563_v51 }
 0xac9   :  { %3641 = vmatprep.subr.mxu1 %v1562_v52 }
 0xaca   :  { %v1249_v6 = vpop.f32.mrf.mxu1  ;;  %3642 = vmatpush3.msra.mxu1 %v1562_v52  ;;  %v3387_v52 = vld [vmem:[#allocation11 + $0x1] ss:$0 sm:$0xff] }
 0xacb   :  { %3619 = vmatmul.mubr.msk.f32.vlgmr.msra.gmra.mxu0 %vm434_vm2, %v1249_v6  ;;  %3643 = vmatprep.subr.mxu1 %v1561_v53 }
 0xacc   :  { %v3613_v7 = vpop.f32.mrf.mxu1  ;;  %3629 = vmatpush3.msra.mxu0 %v1457_v38  ;;  %3644 = vmatpush3.msra.mxu1 %v1561_v53 }
 0xacd   :  { %3630 = vmatprep.subr.mxu0 %v1456_v39  ;;  %3645 = vmatprep.subr.mxu1 %v1560_v54 }
 0xace   :  { %3631 = vmatpush3.msra.mxu0 %v1456_v39  ;;  %3646 = vmatpush3.msra.mxu1 %v1560_v54 }
 0xacf   :  { %3632 = vmatprep.subr.mxu0 %v1455_v41  ;;  %3647 = vmatprep.subr.mxu1 %v1559_v55 }
 0xad0   :  { %3633 = vmatpush3.msra.mxu0 %v1455_v41  ;;  %3648 = vmatpush3.msra.mxu1 %v1559_v55 }
 0xad1   :  { %3634 = vmatprep.subr.mxu0 %v1454_v42  ;;  %3649 = vmatprep.subr.mxu1 %v1558_v56 }
 0xad2   :  { %3635 = vmatpush3.msra.mxu0 %v1454_v42  ;;  %3650 = vmatpush3.msra.mxu1 %v1558_v56  ;;  %v3377_v42 = vld [vmem:[#allocation20] ss:$0 sm:$0xff] }
 0xad3   :  { %3651 = vmatprep.subr.mxu1 %v1557_v57 }
 0xad4   :  { %3652 = vmatpush3.msra.mxu1 %v1557_v57 }
 0xad5   :  { %3653 = vmatprep.subr.mxu1 %v1556_v58 }
 0xad6   :  { %3654 = vmatpush3.msra.mxu1 %v1556_v58 }
 0xad7   :  { %3674 = vmatprep.subr.mxu1 %v4288_v37 }
 0xb87   :  { %v1395_v9 = vpop.f32.mrf.mxu1 }
 0xb89   :  { %v3627_v10 = vpop.f32.mrf.mxu1 }
 0xb8b   :  { %v1322_v12 = vpop.f32.mrf.mxu0 }
 0xb8c   :  { %v1396_v13 = vadd.f32 %v1395_v9, %v1322_v12 }
 0xb8d   :  { %v3620_v14 = vpop.f32.mrf.mxu0 }
 0xb8e   :  { %v1407_v16 = vadd.f32 %v3368_v47, %v1396_v13 }
 0xb90   :  { %v1409_v17 = vadd.f32 %v1407_v16, %v4520_v36  ;;  %v3369_v36 = vld [vmem:[#allocation14] ss:$0 sm:$0xff] }
 0xb92   :  { %v1415_v18 = vsel %vm290_vm0, %v1409_v17, 0.0 }
 0xb93   :  { %1416 = vadd.xlane.f32.xlu0 %v1415_v18 }
 0xb97   :  { %1425 = vadd.xlane.f32.xlu0 %v1424_v20 }
 0xc1c   :  { %v1417_v21 = vpop.xlane.xlu0 %1416 }
 0xc1d   :  { %v1419_v22 = vmul.f32 0.03125, %v1417_v21 }
 0xc1f   :  { %v1421_v23 = vsub.f32 %v1409_v17, %v1419_v22 }
 0xc20   :  { %v1426_v24 = vpop.xlane.xlu0 %1425 }
 0xc21   :  { %v1430_v25 = vmul.f32 0.03125, %v1426_v24  ;;  %v1423_v26 = vmul.f32 %v1421_v23, %v1421_v23 }
 0xc23   :  { %v1432_v27 = vadd.f32 1e-12, %v1430_v25  ;;  %v1427_v28 = vsel %vm290_vm0, %v1423_v26, 0.0 }
 0xc24   :  { %1428 = vadd.xlane.f32.xlu1 %v1427_v28  ;;  %v3381_v28 = vld [vmem:[%s4959_s1 + $0x30] sm:$0xff] }
 0xc25   :  { %3838 = vrsqrt.f32 %v1432_v27  ;;  %v3382_v27 = vld [vmem:[%s4959_s1 + $0x38] sm:$0xff] }
 0xc26   :  { %3658 = vmatprep.subr.mxu0 %v3382_v27 }
 0xc32   :  { %v3839_v29 = vpop.eup %3838 }
 0xc33   :  { %v1436_v30 = vmul.f32 %v3839_v29, %v1420_v15  ;;  %v3380_v29 = vld [vmem:[%s4959_s1 + $0x28] sm:$0xff] }
 0xc35   :  { %v1444_v33 = vmul.f32 %v3369_v36, %v1436_v30 }
 0xc37   :  { %v4648_v35 = vadd.f32 %v3370_v32, %v1444_v33 }
 0xc39   :  { %3636 = vmatprep.mubr.msk.f32.mxu0 %vm290_vm0, %v4648_v35 }
 0xcad   :  { %v1429_v43 = vpop.xlane.xlu1 %1428 }
 0xcae   :  { %v1431_v44 = vmul.f32 0.03125, %v1429_v43 }
 0xcb0   :  { %v1433_v45 = vadd.f32 1e-12, %v1431_v44 }
 0xcb2   :  { %3840 = vrsqrt.f32 %v1433_v45 }
 0xcbf   :  { %v3841_v46 = vpop.eup %3840 }
 0xcc0   :  { %v1437_v47 = vmul.f32 %v3841_v46, %v1421_v23 }
 0xcc2   :  { %v1445_v49 = vmul.f32 %v3369_v36, %v1437_v47  ;;  %v3379_v36 = vld [vmem:[%s4959_s1 + $0x20] sm:$0xff]  ;;  %v3378_v47 = vld [vmem:[#allocation22] ss:$0 sm:$0xff] }
 0xcc4   :  { %v1453_v50 = vadd.f32 %v3370_v32, %v1445_v49 }
 0xcc6   :  { %3637 = vmatmul.mubr.msk.f32.vlgmr.msra.gmra.mxu0 %vm290_vm0, %v1453_v50 }
 0xcc7   :  { %3659 = vmatpush3.msra.mxu0 %v3382_v27 }
 0xcc8   :  { %3660 = vmatprep.subr.mxu0 %v3381_v28 }
 0xcc9   :  { %3661 = vmatpush3.msra.mxu0 %v3381_v28 }
 0xcca   :  { %3662 = vmatprep.subr.mxu0 %v3380_v29 }
 0xccb   :  { %3663 = vmatpush3.msra.mxu0 %v3380_v29 }
 0xccc   :  { %3664 = vmatprep.subr.mxu0 %v3379_v36 }
 0xccd   :  { %3665 = vmatpush3.msra.mxu0 %v3379_v36 }
 0xcce   :  { %3669 = vmatprep.subr.mxu0 %v4288_v37 }
 0xd86   :  { %v3638_v60 = vpop.f32.mrf.mxu0 }
 0xd87   :  { %v1543_v61 = vadd.f32 %v3638_v60, %v3371_v59 }
 0xd88   :  { %v1537_v34 = vpop.f32.mrf.mxu0 }
 0xd89   :  { %v1549_v62 = vmul.f32 0.70710677, %v1543_v61  ;;  %v1538_v63 = vadd.f32 %v3371_v59, %v1537_v34  ;;  %v1547_v5 = vmul.f32 0.5, %v1543_v61 }
 0xd8b   :  { %3842 = verf.f32 %v1549_v62  ;;  %v1548_v0 = vmul.f32 0.70710677, %v1538_v63  ;;  %v1546_v4 = vmul.f32 0.5, %v1538_v63 }
 0xd8d   :  { %3844 = verf.f32 %v1548_v0 }
 0xd98   :  { %v3843_v1 = vpop.eup %3842 }
 0xd99   :  { %v1553_v3 = vadd.f32 1.0, %v3843_v1 }
 0xd9a   :  { %v3845_v2 = vpop.eup %3844 }
 0xd9b   :  { %v1552_v40 = vadd.f32 1.0, %v3845_v2  ;;  %v1555_v7 = vmul.f32 %v1553_v3, %v1547_v5 }
 0xd9d   :  { %v1554_v6 = vmul.f32 %v1552_v40, %v1546_v4 }
 0xd9f   :  { %3655 = vmatprep.mubr.msk.f32.mxu1 %vm1571_vm4, %v1554_v6 }
 0xda0   :  { %3656 = vmatmul.mubr.msk.f32.vlgmr.msra.gmra.mxu1 %vm1571_vm4, %v1555_v7 }
 0xda1   :  { %3676 = vmatprep.mubr.msk.f32.mxu1 %vm4289_vm1, %v4288_v37 }
 0xe60   :  { %v3657_v9 = vpop.f32.mrf.mxu1 }
 0xe61   :  { %v1650_v10 = vadd.f32 %v3657_v9, %v3374_v8 }
 0xe62   :  { %v1644_v11 = vpop.f32.mrf.mxu1 }
 0xe63   :  { %v1645_v12 = vadd.f32 %v3374_v8, %v1644_v11  ;;  %v1654_v13 = vadd.f32 %v1650_v10, %v1453_v50 }
 0xe65   :  { %v1660_v14 = vsel %vm290_vm0, %v1654_v13, 0.0  ;;  %v1653_v15 = vadd.f32 %v1645_v12, %v4648_v35 }
 0xe66   :  { %1661 = vadd.xlane.f32.xlu1 %v1660_v14 }
 0xe67   :  { %v1657_v16 = vsel %vm290_vm0, %v1653_v15, 0.0 }
 0xe68   :  { %1658 = vadd.xlane.f32.xlu0 %v1657_v16 }
 0xeef   :  { %v1662_v17 = vpop.xlane.xlu1 %1661 }
 0xef0   :  { %v1664_v18 = vmul.f32 0.03125, %v1662_v17 }
 0xef1   :  { %v1659_v19 = vpop.xlane.xlu0 %1658 }
 0xef2   :  { %v1666_v20 = vsub.f32 %v1654_v13, %v1664_v18  ;;  %v1663_v21 = vmul.f32 0.03125, %v1659_v19 }
 0xef4   :  { %v1665_v22 = vsub.f32 %v1653_v15, %v1663_v21  ;;  %v1668_v23 = vmul.f32 %v1666_v20, %v1666_v20  ;;  %v4759_v21 = vld [vmem:[%s4960_s4 + $0x28] sm:$0xff] }
 0xef6   :  { %v1672_v24 = vsel %vm290_vm0, %v1668_v23, 0.0  ;;  %v1667_v25 = vmul.f32 %v1665_v22, %v1665_v22  ;;  %v3386_v23 = vld [vmem:[%s4960_s4 + $0x38] sm:$0xff] }
 0xef7   :  { %1673 = vadd.xlane.f32.xlu1 %v1672_v24  ;;  %v3385_v24 = vld [vmem:[%s4960_s4 + $0x30] sm:$0xff] }
 0xef8   :  { %v1669_v26 = vsel %vm290_vm0, %v1667_v25, 0.0 }
 0xef9   :  { %1670 = vadd.xlane.f32.xlu0 %v1669_v26 }
 0xf80   :  { %v1674_v30 = vpop.xlane.xlu1 %1673 }
 0xf81   :  { %v1676_v32 = vmul.f32 0.03125, %v1674_v30 }
 0xf82   :  { %v1671_v33 = vpop.xlane.xlu0 %1670 }
 0xf83   :  { %v1678_v35 = vadd.f32 1e-12, %v1676_v32  ;;  %v1675_v38 = vmul.f32 0.03125, %v1671_v33 }
 0xf85   :  { %3846 = vrsqrt.f32 %v1678_v35  ;;  %v1677_v39 = vadd.f32 1e-12, %v1675_v38 }
 0xf87   :  { %3848 = vrsqrt.f32 %v1677_v39 }
 0xf92   :  { %v3847_v41 = vpop.eup %3846 }
 0xf93   :  { %v1682_v43 = vmul.f32 %v3847_v41, %v1666_v20 }
 0xf94   :  { %v3849_v44 = vpop.eup %3848 }
 0xf95   :  { %v1681_v45 = vmul.f32 %v3849_v44, %v1665_v22  ;;  %v1690_v46 = vmul.f32 %v3377_v42, %v1682_v43  ;;  %v4769_v22 = vld [vmem:[%s4960_s4 + $0x20] sm:$0xff] }
 0xf97   :  { %v1689_v49 = vmul.f32 %v3377_v42, %v1681_v45  ;;  %v4714_v51 = vadd.f32 %v3378_v47, %v1690_v46 }
 0xf99   :  { %v4712_v50 = vadd.f32 %v3378_v47, %v1689_v49 }
 0xf9b   :  { %3666 = vmatprep.mubr.msk.f32.mxu0 %vm290_vm0, %v4712_v50 }
 0xf9c   :  { %3667 = vmatmul.mubr.msk.f32.vlgmr.msra.gmra.mxu0 %vm290_vm0, %v4714_v51 }
 0xf9d   :  { %3671 = vmatprep.mubr.msk.f32.mxu0 %vm4289_vm1, %v4288_v37 }
0x105c   :  { %v3668_v53 = vpop.f32.mrf.mxu0 }
0x105d   :  { %v4722_v54 = vadd.f32 %v3668_v53, %v3387_v52 }
0x105e   :  { %v1789_v55 = vpop.f32.mrf.mxu0 }
0x105f   :  { %v1790_v56 = vadd.f32 %v3387_v52, %v1789_v55  ;;  %v3406_v55 = vld [vmem:[#allocation13 + $0x1] ss:$0 sm:$0xff] }
0x1061   :  { %1966 = vrot.lane.b32.xlu1 %v1790_v56, %s4291_s9  ;;  %1799 = vrot.lane.b32.xlu0 %v1790_v56, %s4290_s17 }
0x1065   :  { %1964 = vrot.lane.b32.xlu1 %v1790_v56, %s4293_s12 }
0x10d3   :  { %v1800_v57 = vpop.permute.xlu0 %1799  ;;  %v1967_v58 = vpop.permute.xlu1 %1966 }
0x10d4   :  { %3670 = vmatpush3.xpose.msk.msra.mxu0 %vm434_vm2, %v1800_v57 }
0x10d5   :  { %3679 = vmatprep.subr.mxu0 %v4288_v37 }
0x10d7   :  { %3672 = vmatmul.mubr.msk.f32.vlgmr.msra.gmra.mxu0 %vm434_vm2, %v1790_v56  ;;  %v1965_v59 = vpop.permute.xlu1 %1964 }
0x10d8   :  { %3680 = vmatpush3.xpose.msk.msra.mxu0 %vm434_vm2, %v1967_v58  ;;  %3681 = vmatprep.mubr.msk.f32.mxu0 %vm4289_vm1, %v4288_v37 }
0x10d9   :  { %3689 = vmatprep.subr.mxu0 %v4288_v37 }
0x10db   :  { %3682 = vmatmul.mubr.msk.f32.vlgmr.msra.gmra.mxu0 %vm434_vm2, %v1965_v59 }
0x10dc   :  { %3693 = vmatprep.mubr.msk.f32.mxu0 %vm4289_vm1, %v4288_v37  ;;  %3690 = vmatpush3.msra.mxu0 %v3386_v23 }
0x10dd   :  { %3691 = vmatprep.subr.mxu0 %v4288_v37 }
0x10de   :  { %3692 = vmatpush3.msra.mxu0 %v3385_v24 }
0x10df   :  { %3703 = vmatprep.subr.mxu0 %v4288_v37 }
0x1197   :  { %v1871_v60 = vpop.f32.mrf.mxu0 }
0x1198   :  { %v1875_v61 = vmul.f32 0.25, %v1871_v60 }
0x1199   :  { %v3673_v34 = vpop.f32.mrf.mxu0 }
0x119a   :  { %v1876_v62 = vadd.f32 %v1875_v61, %v4545_v48 }
0x119b   :  { %v2038_v63 = vpop.f32.mrf.mxu0 }
0x119c   :  { %v2042_v0 = vmul.f32 0.25, %v2038_v63  ;;  %v1877_v1 = vsel %vm515_vm3, %v1876_v62, -inf }
0x119d   :  { %1878 = vmax.xlane.f32.xlu1 %v1877_v1  ;;  %v3683_v2 = vpop.f32.mrf.mxu0 }
0x119e   :  { %v2043_v3 = vadd.f32 %v2042_v0, %v4545_v48 }
0x11a0   :  { %v2044_v4 = vsel %vm515_vm3, %v2043_v3, -inf }
0x11a1   :  { %2045 = vmax.xlane.f32.xlu0 %v2044_v4 }
0x11ae   :  { %1888 = vrot.lane.b32.xlu1 %v1790_v56, %s4292_s7 }
0x11b2   :  { %2278 = vrot.lane.b32.xlu1 %v4722_v54, %s4290_s17 }
0x11b6   :  { %2445 = vrot.lane.b32.xlu1 %v4722_v54, %s4291_s9 }
0x11ba   :  { %2443 = vrot.lane.b32.xlu1 %v4722_v54, %s4293_s12 }
0x1226   :  { %v1879_v40 = vpop.xlane.xlu1 %1878 }
0x1227   :  { %v1880_v5 = vsub.f32 %v1876_v62, %v1879_v40 }
0x1229   :  { %v1881_v6 = vmul.f32 1.442695, %v1880_v5 }
0x122a   :  { %v1889_v7 = vpop.permute.xlu1 %1888  ;;  %v2046_v8 = vpop.xlane.xlu0 %2045 }
0x122b   :  { %3850 = vpow2.f32 %v1881_v6  ;;  %v2047_v48 = vsub.f32 %v2043_v3, %v2046_v8  ;;  %3675 = vmatpush3.msra.mxu1 %v1889_v7 }
0x122c   :  { %3684 = vmatprep.subr.mxu1 %v4288_v37 }
0x122d   :  { %v2048_v9 = vmul.f32 1.442695, %v2047_v48 }
0x122e   :  { %v2279_v25 = vpop.permute.xlu1 %2278 }
0x122f   :  { %3852 = vpow2.f32 %v2048_v9 }
0x1232   :  { %v2446_v29 = vpop.permute.xlu1 %2445 }
0x1236   :  { %v2444_v30 = vpop.permute.xlu1 %2443 }
0x1238   :  { %v3851_v10 = vpop.eup %3850 }
0x1239   :  { %v1883_v11 = vsel %vm515_vm3, %v3851_v10, 0.0 }
0x123a   :  { %1884 = vadd.xlane.f32.xlu0 %v1883_v11 }
0x123c   :  { %v3853_v12 = vpop.eup %3852 }
0x123d   :  { %v2050_v13 = vsel %vm515_vm3, %v3853_v12, 0.0 }
0x123e   :  { %2051 = vadd.xlane.f32.xlu0 %v2050_v13 }
0x1254   :  { %2055 = vrot.lane.b32.xlu0 %v1790_v56, %s4294_s0 }
0x12c3   :  { %v1885_v14 = vpop.xlane.xlu0 %1884 }
0x12c4   :  { %3854 = vrcp.f32 %v1885_v14 }
0x12c7   :  { %v2052_v15 = vpop.xlane.xlu0 %2051 }
0x12c8   :  { %3856 = vrcp.f32 %v2052_v15 }
0x12cb   :  { %v2056_v18 = vpop.permute.xlu0 %2055 }
0x12d1   :  { %v3855_v16 = vpop.eup %3854 }
0x12d2   :  { %v1887_v17 = vmul.f32 %v3855_v16, %v3851_v10 }
0x12d4   :  { %3677 = vmatmul.mubr.msk.f32.vlgmr.msra.gmra.mxu1 %vm515_vm3, %v1887_v17 }
0x12d5   :  { %v3857_v19 = vpop.eup %3856  ;;  %3685 = vmatpush3.msra.mxu1 %v2056_v18  ;;  %3686 = vmatprep.mubr.msk.f32.mxu1 %vm4289_vm1, %v4288_v37 }
0x12d6   :  { %v2054_v20 = vmul.f32 %v3857_v19, %v3853_v12  ;;  %3696 = vmatprep.subr.mxu1 %v4288_v37 }
0x12d8   :  { %3687 = vmatmul.mubr.msk.f32.vlgmr.msra.gmra.mxu1 %vm515_vm3, %v2054_v20 }
0x12d9   :  { %3697 = vmatpush3.msra.mxu1 %v4759_v21  ;;  %3700 = vmatprep.mubr.msk.f32.mxu1 %vm4289_vm1, %v4288_v37 }
0x12da   :  { %3698 = vmatprep.subr.mxu1 %v4288_v37 }
0x12db   :  { %3699 = vmatpush3.msra.mxu1 %v4769_v22 }
0x12dc   :  { %3708 = vmatprep.subr.mxu1 %v4288_v37 }
0x1394   :  { %v1960_v26 = vpop.f32.mrf.mxu1 }
0x1395   :  { %3701 = vmatmul.mubr.msk.f32.vlgmr.msra.gmra.mxu1 %vm434_vm2, %v1960_v26 }
0x1396   :  { %v3678_v27 = vpop.f32.mrf.mxu1  ;;  %3710 = vmatprep.mubr.msk.f32.mxu1 %vm4289_vm1, %v4288_v37 }
0x1398   :  { %v2127_v28 = vpop.f32.mrf.mxu1 }
0x1399   :  { %3694 = vmatmul.mubr.msk.f32.vlgmr.msra.gmra.mxu0 %vm434_vm2, %v2127_v28 }
0x139a   :  { %3704 = vmatpush3.xpose.msk.msra.mxu0 %vm434_vm2, %v2279_v25  ;;  %v3688_v36 = vpop.f32.mrf.mxu1  ;;  %3705 = vmatprep.mubr.msk.f32.mxu0 %vm4289_vm1, %v4288_v37 }
0x139b   :  { %3713 = vmatprep.subr.mxu0 %v4288_v37 }
0x139d   :  { %3706 = vmatmul.mubr.msk.f32.vlgmr.msra.gmra.mxu0 %vm434_vm2, %v4722_v54 }
0x139e   :  { %3714 = vmatpush3.xpose.msk.msra.mxu0 %vm434_vm2, %v2446_v29  ;;  %3715 = vmatprep.mubr.msk.f32.mxu0 %vm4289_vm1, %v4288_v37 }
0x139f   :  { %3723 = vmatprep.subr.mxu0 %v4288_v37 }
0x13a1   :  { %3716 = vmatmul.mubr.msk.f32.vlgmr.msra.gmra.mxu0 %vm434_vm2, %v2444_v30 }
0x13a2   :  { %3724 = vmatpush3.msra.mxu0 %v3386_v23  ;;  %3727 = vmatprep.mubr.msk.f32.mxu0 %vm4289_vm1, %v4288_v37 }
0x13a3   :  { %3725 = vmatprep.subr.mxu0 %v4288_v37 }
0x13a4   :  { %3726 = vmatpush3.msra.mxu0 %v3385_v24 }
0x1455   :  { %v2273_v32 = vpop.f32.mrf.mxu1 }
0x1457   :  { %v3702_v33 = vpop.f32.mrf.mxu1 }
0x1458   :  { %v3408_v33 = vld [vmem:[#allocation16 + $0x1] ss:$0 sm:$0xff] }
0x1459   :  { %v2200_v35 = vpop.f32.mrf.mxu0 }
0x145a   :  { %v2274_v53 = vadd.f32 %v2273_v32, %v2200_v35 }
0x145b   :  { %v3695_v38 = vpop.f32.mrf.mxu0 }
0x145c   :  { %v2764_v56 = vadd.f32 %v3406_v55, %v2274_v53 }
0x145d   :  { %v2350_v39 = vpop.f32.mrf.mxu0 }
0x145e   :  { %v2354_v41 = vmul.f32 0.25, %v2350_v39  ;;  %v2766_v57 = vadd.f32 %v2764_v56, %v4712_v50  ;;  %v3412_v39 = vld [vmem:[%s4927_s11 + $0x38] sm:$0xff]  ;;  %v3422_v56 = vld [vmem:[%s4929_s13 + $0x70] sm:$0xff] }
0x145f   :  { %v3707_v42 = vpop.f32.mrf.mxu0  ;;  %3737 = vmatprep.subr.mxu0 %v3412_v39 }
0x1460   :  { %v2355_v43 = vadd.f32 %v2354_v41, %v4617_v31  ;;  %v2772_v58 = vsel %vm290_vm0, %v2766_v57, 0.0  ;;  %v3411_v41 = vld [vmem:[%s4927_s11 + $0x30] sm:$0xff]  ;;  %v3410_v42 = vld [vmem:[%s4927_s11 + $0x28] sm:$0xff] }
0x1461   :  { %v2517_v44 = vpop.f32.mrf.mxu0 }
0x1462   :  { %v2521_v45 = vmul.f32 0.25, %v2517_v44  ;;  %v2356_v46 = vsel %vm515_vm3, %v2355_v43, -inf }
0x1463   :  { %2357 = vmax.xlane.f32.xlu0 %v2356_v46  ;;  %v3717_v47 = vpop.f32.mrf.mxu0 }
0x1464   :  { %v2522_v49 = vadd.f32 %v2521_v45, %v4617_v31 }
0x1466   :  { %v2523_v52 = vsel %vm515_vm3, %v2522_v49, -inf }
0x1467   :  { %2524 = vmax.xlane.f32.xlu1 %v2523_v52 }
0x1478   :  { %2534 = vrot.lane.b32.xlu1 %v4722_v54, %s4294_s0 }
0x149c   :  { %2773 = vadd.xlane.f32.xlu1 %v2772_v58  ;;  %v3420_v58 = vld [vmem:[%s4929_s13 + $0x60] sm:$0xff] }
0x14ec   :  { %v2358_v59 = vpop.xlane.xlu0 %2357 }
0x14ed   :  { %v2359_v60 = vsub.f32 %v2355_v43, %v2358_v59  ;;  %v3409_v43 = vld [vmem:[%s4927_s11 + $0x20] sm:$0xff]  ;;  %v3419_v59 = vld [vmem:[%s4929_s13 + $0x58] sm:$0xff]  ;;  %s3323_s11 = sshll.u32 %s4295_s26, 4  ;;  %s3324_s11 = int_to_ptr.vmem [resolvable:$true] %s3323_s11 }
0x14ee   :  { %s4206_s27 = scalar_lea.vmem %s3324_s11, 256  ;;  %p4211_p11 = scmp.lt.s32.totalorder %s3324_s11, %s3324_s11 }
0x14ef   :  { %v2360_v61 = vmul.f32 1.442695, %v2359_v60  ;;  %v3418_v60 = vld [vmem:[%s4929_s13 + $0x50] sm:$0xff]  ;;  %p4207_p10 = scmp.ne.s32.totalorder %s3324_s11, %s4206_s27  ;;  %p4212_p12 = scmp.lt.s32.totalorder %s4206_s27, %s4206_s27 }
0x14f0   :  { %v2525_v34 = vpop.xlane.xlu1 %2524 }
0x14f1   :  { %3858 = vpow2.f32 %v2360_v61  ;;  %v2526_v31 = vsub.f32 %v2522_v49, %v2525_v34  ;;  %v3417_v61 = vld [vmem:[%s4929_s13 + $0x48] sm:$0xff]  ;;  %v3416_v34 = vld [vmem:[%s4929_s13 + $0x40] sm:$0xff]  ;;  %p4213_p13 = por %p4212_p12, %p4211_p11 }
0x14f3   :  { %v2527_v62 = vmul.f32 1.442695, %v2526_v31  ;;  %v3413_v31 = vld [vmem:[#allocation17 + $0x1] ss:$0 sm:$0xff]  ;;  %p4214_p0 = pnand %p4213_p13, %p4207_p10 }
0x14f4   :  { %v2535_v6 = vpop.permute.xlu1 %2534 }
0x14f5   :  { %3860 = vpow2.f32 %v2527_v62 }
0x14fe   :  { %v3859_v63 = vpop.eup %3858 }
0x14ff   :  { %v2362_v0 = vsel %vm515_vm3, %v3859_v63, 0.0 }
0x1500   :  { %2363 = vadd.xlane.f32.xlu0 %v2362_v0 }
0x1502   :  { %v3861_v1 = vpop.eup %3860 }
0x1503   :  { %v2529_v2 = vsel %vm515_vm3, %v3861_v1, 0.0 }
0x1504   :  { %2530 = vadd.xlane.f32.xlu0 %v2529_v2 }
0x151a   :  { %2367 = vrot.lane.b32.xlu0 %v4722_v54, %s4292_s7 }
0x1525   :  { %v2774_v11 = vpop.xlane.xlu1 %2773 }
0x1526   :  { %v2778_v14 = vmul.f32 0.03125, %v2774_v11 }
0x1528   :  { %v2780_v18 = vsub.f32 %v2766_v57, %v2778_v14  ;;  %v3421_v57 = vld [vmem:[%s4929_s13 + $0x68] sm:$0xff] }
0x1589   :  { %v2364_v50 = vpop.xlane.xlu0 %2363 }
0x158a   :  { %3862 = vrcp.f32 %v2364_v50 }
0x158d   :  { %v2531_v3 = vpop.xlane.xlu0 %2530 }
0x158e   :  { %3864 = vrcp.f32 %v2531_v3 }
0x1591   :  { %v2368_v4 = vpop.permute.xlu0 %2367 }
0x1592   :  { %3709 = vmatpush3.msra.mxu1 %v2368_v4 }
0x1593   :  { %3718 = vmatprep.subr.mxu1 %v4288_v37 }
0x1597   :  { %v3863_v40 = vpop.eup %3862 }
0x1598   :  { %v2366_v5 = vmul.f32 %v3863_v40, %v3859_v63 }
0x159a   :  { %3711 = vmatmul.mubr.msk.f32.vlgmr.msra.gmra.mxu1 %vm515_vm3, %v2366_v5 }
0x159b   :  { %v3865_v7 = vpop.eup %3864  ;;  %3719 = vmatpush3.msra.mxu1 %v2535_v6  ;;  %3720 = vmatprep.mubr.msk.f32.mxu1 %vm4289_vm1, %v4288_v37 }
0x159c   :  { %v2533_v8 = vmul.f32 %v3865_v7, %v3861_v1  ;;  %3730 = vmatprep.subr.mxu1 %v4288_v37 }
0x159e   :  { %3721 = vmatmul.mubr.msk.f32.vlgmr.msra.gmra.mxu1 %vm515_vm3, %v2533_v8 }
0x159f   :  { %3731 = vmatpush3.msra.mxu1 %v4759_v21  ;;  %3734 = vmatprep.mubr.msk.f32.mxu1 %vm4289_vm1, %v4288_v37  ;;  %v2782_v21 = vmul.f32 %v2780_v18, %v2780_v18 }
0x15a0   :  { %3732 = vmatprep.subr.mxu1 %v4288_v37 }
0x15a1   :  { %3733 = vmatpush3.msra.mxu1 %v4769_v22  ;;  %v2784_v22 = vsel %vm290_vm0, %v2782_v21, 0.0 }
0x165a   :  { %v2439_v54 = vpop.f32.mrf.mxu1 }
0x165b   :  { %3735 = vmatmul.mubr.msk.f32.vlgmr.msra.gmra.mxu1 %vm434_vm2, %v2439_v54 }
0x165c   :  { %v3712_v48 = vpop.f32.mrf.mxu1 }
0x165d   :  { %v3424_v48 = vld [vmem:[#allocation19 + $0x1] ss:$0 sm:$0xff] }
0x165e   :  { %v2606_v9 = vpop.f32.mrf.mxu1 }
0x165f   :  { %3728 = vmatmul.mubr.msk.f32.vlgmr.msra.gmra.mxu0 %vm434_vm2, %v2606_v9 }
0x1660   :  { %v3722_v10 = vpop.f32.mrf.mxu1  ;;  %3738 = vmatpush3.msra.mxu0 %v3412_v39  ;;  %v3427_v39 = vld [vmem:[#allocation20 + $0x1] ss:$0 sm:$0xff] }
0x1661   :  { %3739 = vmatprep.subr.mxu0 %v3411_v41 }
0x1662   :  { %3740 = vmatpush3.msra.mxu0 %v3411_v41 }
0x1663   :  { %3741 = vmatprep.subr.mxu0 %v3410_v42 }
0x1664   :  { %3742 = vmatpush3.msra.mxu0 %v3410_v42 }
0x1665   :  { %3743 = vmatprep.subr.mxu0 %v3409_v43 }
0x1666   :  { %3744 = vmatpush3.msra.mxu0 %v3409_v43  ;;  %v3428_v43 = vld [vmem:[#allocation22 + $0x1] ss:$0 sm:$0xff] }
0x171b   :  { %v2752_v12 = vpop.f32.mrf.mxu1 }
0x171d   :  { %v3736_v13 = vpop.f32.mrf.mxu1 }
0x171f   :  { %v2679_v15 = vpop.f32.mrf.mxu0 }
0x1720   :  { %v2753_v16 = vadd.f32 %v2752_v12, %v2679_v15 }
0x1721   :  { %v3729_v17 = vpop.f32.mrf.mxu0 }
0x1722   :  { %v2765_v19 = vadd.f32 %v3406_v55, %v2753_v16  ;;  %v3423_v55 = vld [vmem:[%s4929_s13 + $0x78] sm:$0xff] }
0x1723   :  { %3748 = vmatprep.subr.mxu1 %v3423_v55 }
0x1724   :  { %v2767_v37 = vadd.f32 %v2765_v19, %v4714_v51  ;;  %v3407_v51 = vld [vmem:[#allocation14 + $0x1] ss:$0 sm:$0xff]  ;;  %3749 = vmatpush3.msra.mxu1 %v3423_v55 }
0x1725   :  { %3750 = vmatprep.subr.mxu1 %v3422_v56 }
0x1726   :  { %v2775_v20 = vsel %vm290_vm0, %v2767_v37, 0.0  ;;  %3751 = vmatpush3.msra.mxu1 %v3422_v56 }
0x1727   :  { %2776 = vadd.xlane.f32.xlu0 %v2775_v20  ;;  %3752 = vmatprep.subr.mxu1 %v3421_v57 }
0x1728   :  { %3753 = vmatpush3.msra.mxu1 %v3421_v57 }
0x1729   :  { %3754 = vmatprep.subr.mxu1 %v3420_v58 }
0x172a   :  { %3755 = vmatpush3.msra.mxu1 %v3420_v58 }
0x172b   :  { %2785 = vadd.xlane.f32.xlu0 %v2784_v22  ;;  %3756 = vmatprep.subr.mxu1 %v3419_v59 }
0x172c   :  { %3757 = vmatpush3.msra.mxu1 %v3419_v59 }
0x172d   :  { %3758 = vmatprep.subr.mxu1 %v3418_v60 }
0x172e   :  { %3759 = vmatpush3.msra.mxu1 %v3418_v60 }
0x172f   :  { %3760 = vmatprep.subr.mxu1 %v3417_v61 }
0x1730   :  { %3761 = vmatpush3.msra.mxu1 %v3417_v61 }
0x1731   :  { %3762 = vmatprep.subr.mxu1 %v3416_v34 }
0x1732   :  { %3763 = vmatpush3.msra.mxu1 %v3416_v34 }
0x17b0   :  { %v2777_v23 = vpop.xlane.xlu0 %2776 }
0x17b1   :  { %v2779_v24 = vmul.f32 0.03125, %v2777_v23 }
0x17b3   :  { %v2781_v25 = vsub.f32 %v2767_v37, %v2779_v24 }
0x17b4   :  { %v2786_v26 = vpop.xlane.xlu0 %2785 }
0x17b5   :  { %v2790_v27 = vmul.f32 0.03125, %v2786_v26  ;;  %v2783_v28 = vmul.f32 %v2781_v25, %v2781_v25  ;;  %v3069_v26 = vld [vmem:[#allocation23 + $0x18] sm:$0xff] }
0x17b6   :  { %3767 = vmatprep.subr.mxu0 %v3069_v26 }
0x17b7   :  { %v2792_v29 = vadd.f32 1e-12, %v2790_v27  ;;  %v2787_v36 = vsel %vm290_vm0, %v2783_v28, 0.0  ;;  %v3068_v27 = vld [vmem:[#allocation23 + $0x10] sm:$0xff]  ;;  %v3067_v28 = vld [vmem:[#allocation23 + $0x8] sm:$0xff] }
0x17b8   :  { %2788 = vadd.xlane.f32.xlu1 %v2787_v36 }
0x17b9   :  { %3866 = vrsqrt.f32 %v2792_v29  ;;  %v3066_v29 = vld [vmem:[#allocation23] sm:$0xff] }
0x17c6   :  { %v3867_v30 = vpop.eup %3866 }
0x17c7   :  { %v2796_v32 = vmul.f32 %v3867_v30, %v2780_v18 }
0x17c9   :  { %v2804_v35 = vmul.f32 %v3407_v51, %v2796_v32 }
0x17cb   :  { %v4828_v38 = vadd.f32 %v3408_v33, %v2804_v35 }
0x17cd   :  { %3745 = vmatprep.mubr.msk.f32.mxu0 %vm290_vm0, %v4828_v38 }
0x1841   :  { %v2789_v44 = vpop.xlane.xlu1 %2788 }
0x1842   :  { %v2791_v45 = vmul.f32 0.03125, %v2789_v44 }
0x1844   :  { %v2793_v46 = vadd.f32 1e-12, %v2791_v45 }
0x1846   :  { %3868 = vrsqrt.f32 %v2793_v46 }
0x1853   :  { %v3869_v47 = vpop.eup %3868 }
0x1854   :  { %v2797_v49 = vmul.f32 %v3869_v47, %v2781_v25 }
0x1856   :  { %v2805_v52 = vmul.f32 %v3407_v51, %v2797_v49 }
0x1858   :  { %v2813_v53 = vadd.f32 %v3408_v33, %v2805_v52  ;;  %v3429_v52 = vld [vmem:[#allocation25] ss:$0 sm:$0xff] }
0x185a   :  { %3746 = vmatmul.mubr.msk.f32.vlgmr.msra.gmra.mxu0 %vm290_vm0, %v2813_v53 }
0x185b   :  { %3768 = vmatpush3.msra.mxu0 %v3069_v26 }
0x185c   :  { %3769 = vmatprep.subr.mxu0 %v3068_v27 }
0x185d   :  { %3770 = vmatpush3.msra.mxu0 %v3068_v27 }
0x185e   :  { %3771 = vmatprep.subr.mxu0 %v3067_v28 }
0x185f   :  { %3772 = vmatpush3.msra.mxu0 %v3067_v28 }
0x1860   :  { %3773 = vmatprep.subr.mxu0 %v3066_v29 }
0x1861   :  { %3774 = vmatpush3.msra.mxu0 %v3066_v29 }
0x191a   :  { %v3747_v62 = vpop.f32.mrf.mxu0 }
0x191b   :  { %v2905_v63 = vadd.f32 %v3747_v62, %v3413_v31 }
0x191c   :  { %v2899_v0 = vpop.f32.mrf.mxu0 }
0x191d   :  { %v2911_v1 = vmul.f32 0.70710677, %v2905_v63  ;;  %v2900_v2 = vadd.f32 %v3413_v31, %v2899_v0  ;;  %v2909_v7 = vmul.f32 0.5, %v2905_v63 }
0x191f   :  { %3870 = verf.f32 %v2911_v1  ;;  %v2910_v50 = vmul.f32 0.70710677, %v2900_v2  ;;  %v2908_v5 = vmul.f32 0.5, %v2900_v2 }
0x1921   :  { %3872 = verf.f32 %v2910_v50 }
0x192c   :  { %v3871_v3 = vpop.eup %3870 }
0x192d   :  { %v2915_v40 = vadd.f32 1.0, %v3871_v3 }
0x192e   :  { %v3873_v4 = vpop.eup %3872 }
0x192f   :  { %v2914_v6 = vadd.f32 1.0, %v3873_v4  ;;  %v2917_v54 = vmul.f32 %v2915_v40, %v2909_v7 }
0x1931   :  { %v2916_v8 = vmul.f32 %v2914_v6, %v2908_v5 }
0x1933   :  { %3764 = vmatprep.mubr.msk.f32.mxu1 %vm1571_vm4, %v2916_v8 }
0x1934   :  { %3765 = vmatmul.mubr.msk.f32.vlgmr.msra.gmra.mxu1 %vm1571_vm4, %v2917_v54 }
0x19f4   :  { %v3766_v9 = vpop.f32.mrf.mxu1 }
0x19f5   :  { %v3013_v10 = vadd.f32 %v3766_v9, %v3424_v48 }
0x19f6   :  { %v3007_v11 = vpop.f32.mrf.mxu1 }
0x19f7   :  { %v3008_v12 = vadd.f32 %v3424_v48, %v3007_v11  ;;  %v3017_v13 = vadd.f32 %v3013_v10, %v2813_v53  ;;  %v3215_v10 = vld [vmem:[%s4937_s21 + $0x18] sm:$0xff]  ;;  %v3214_v11 = vld [vmem:[%s4937_s21 + $0x10] sm:$0xff] }
0x19f8   :  { %3778 = vmatprep.subr.mxu0 %v3215_v10 }
0x19f9   :  { %v3025_v14 = vsel %vm290_vm0, %v3017_v13, 0.0  ;;  %v3016_v15 = vadd.f32 %v3008_v12, %v4828_v38  ;;  %v3213_v12 = vld [vmem:[%s4937_s21 + $0x8] sm:$0xff] }
0x19fa   :  { %3026 = vadd.xlane.f32.xlu1 %v3025_v14 }
0x19fb   :  { %v3022_v16 = vsel %vm290_vm0, %v3016_v15, 0.0 }
0x19fc   :  { %3023 = vadd.xlane.f32.xlu0 %v3022_v16 }
0x1a83   :  { %v3027_v17 = vpop.xlane.xlu1 %3026 }
0x1a84   :  { %v3029_v18 = vmul.f32 0.03125, %v3027_v17 }
0x1a85   :  { %v3024_v19 = vpop.xlane.xlu0 %3023 }
0x1a86   :  { %v3031_v37 = vsub.f32 %v3017_v13, %v3029_v18  ;;  %v3028_v20 = vmul.f32 0.03125, %v3024_v19  ;;  %v3212_v13 = vld [vmem:[%s4937_s21] sm:$0xff] }
0x1a88   :  { %v3030_v21 = vsub.f32 %v3016_v15, %v3028_v20  ;;  %v3033_v22 = vmul.f32 %v3031_v37, %v3031_v37  ;;  %v3432_v20 = vld [vmem:[#allocation26] ss:$0 sm:$0xff] }
0x1a8a   :  { %v3037_v23 = vsel %vm290_vm0, %v3033_v22, 0.0  ;;  %v3032_v24 = vmul.f32 %v3030_v21, %v3030_v21 }
0x1a8b   :  { %3038 = vadd.xlane.f32.xlu1 %v3037_v23 }
0x1a8c   :  { %v3034_v25 = vsel %vm290_vm0, %v3032_v24, 0.0 }
0x1a8d   :  { %3035 = vadd.xlane.f32.xlu0 %v3034_v25  ;;  %v3433_v25 = vld [vmem:[%s4936_s20] ss:$0 sm:$0xff] }
0x1b14   :  { %v3039_v36 = vpop.xlane.xlu1 %3038 }
0x1b15   :  { %v3041_v30 = vmul.f32 0.03125, %v3039_v36 }
0x1b16   :  { %v3036_v51 = vpop.xlane.xlu0 %3035 }
0x1b17   :  { %v3043_v32 = vadd.f32 1e-12, %v3041_v30  ;;  %v3040_v33 = vmul.f32 0.03125, %v3036_v51 }
0x1b19   :  { %3874 = vrsqrt.f32 %v3043_v32  ;;  %v3042_v35 = vadd.f32 1e-12, %v3040_v33 }
0x1b1b   :  { %3876 = vrsqrt.f32 %v3042_v35 }
0x1b26   :  { %v3875_v38 = vpop.eup %3874 }
0x1b27   :  { %v3047_v41 = vmul.f32 %v3875_v38, %v3031_v37 }
0x1b28   :  { %v3877_v42 = vpop.eup %3876 }
0x1b29   :  { %v3046_v44 = vmul.f32 %v3877_v42, %v3030_v21  ;;  %v3055_v45 = vmul.f32 %v3427_v39, %v3047_v41 }
0x1b2b   :  { %v3054_v46 = vmul.f32 %v3427_v39, %v3046_v44  ;;  %v3063_v47 = vadd.f32 %v3428_v43, %v3055_v45 }
0x1b2d   :  { %v3062_v49 = vadd.f32 %v3428_v43, %v3054_v46  ;;  %3065 = vst.msk [vmem:[#allocation29 + $0x8] sm:$0xff] %vm290_vm0, %v3063_v47 }
0x1b2f   :  { %3775 = vmatprep.mubr.msk.f32.mxu0 %vm290_vm0, %v3062_v49  ;;  %3064 = vst.msk [vmem:[#allocation29] sm:$0xff] %vm290_vm0, %v3062_v49 }
0x1b30   :  { %3776 = vmatmul.mubr.msk.f32.vlgmr.msra.gmra.mxu0 %vm290_vm0, %v3063_v47 }
0x1b31   :  { %3779 = vmatpush3.msra.mxu0 %v3215_v10 }
0x1b32   :  { %3780 = vmatprep.subr.mxu0 %v3214_v11 }
0x1b33   :  { %3781 = vmatpush3.msra.mxu0 %v3214_v11 }
0x1b34   :  { %3782 = vmatprep.subr.mxu0 %v3213_v12 }
0x1b35   :  { %3783 = vmatpush3.msra.mxu0 %v3213_v12 }
0x1b36   :  { %3784 = vmatprep.subr.mxu0 %v3212_v13 }
0x1b37   :  { %3785 = vmatpush3.msra.mxu0 %v3212_v13 }
0x1bf0   :  { %v3777_v53 = vpop.f32.mrf.mxu0 }
0x1bf1   :  { %v3155_v55 = vadd.f32 %v3777_v53, %v3429_v52 }
0x1bf2   :  { %v3149_v56 = vpop.f32.mrf.mxu0 }
0x1bf3   :  { %v3161_v57 = vmul.f32 0.70710677, %v3155_v55  ;;  %v3150_v58 = vadd.f32 %v3429_v52, %v3149_v56  ;;  %v3159_v61 = vmul.f32 0.5, %v3155_v55 }
0x1bf5   :  { %3878 = verf.f32 %v3161_v57  ;;  %v3160_v59 = vmul.f32 0.70710677, %v3150_v58  ;;  %v3158_v62 = vmul.f32 0.5, %v3150_v58 }
0x1bf7   :  { %3880 = verf.f32 %v3160_v59 }
0x1c02   :  { %v3879_v60 = vpop.eup %3878 }
0x1c03   :  { %v3165_v34 = vadd.f32 1.0, %v3879_v60 }
0x1c04   :  { %v3881_v31 = vpop.eup %3880 }
0x1c05   :  { %v3167_v63 = vmul.f32 %v3165_v34, %v3159_v61  ;;  %v3164_v0 = vadd.f32 1.0, %v3881_v31 }
0x1c07   :  { %v3173_v1 = vsel %vm290_vm0, %v3167_v63, 0.0  ;;  %v3166_v2 = vmul.f32 %v3164_v0, %v3158_v62 }
0x1c08   :  { %3174 = vadd.xlane.f32.xlu1 %v3173_v1 }
0x1c09   :  { %v3170_v50 = vsel %vm290_vm0, %v3166_v2, 0.0 }
0x1c0a   :  { %3171 = vadd.xlane.f32.xlu0 %v3170_v50 }
0x1c91   :  { %v3175_v3 = vpop.xlane.xlu1 %3174 }
0x1c92   :  { %v3177_v4 = vmul.f32 0.03125, %v3175_v3 }
0x1c93   :  { %v3172_v40 = vpop.xlane.xlu0 %3171 }
0x1c94   :  { %v3179_v5 = vsub.f32 %v3167_v63, %v3177_v4  ;;  %v3176_v6 = vmul.f32 0.03125, %v3172_v40 }
0x1c96   :  { %v3178_v7 = vsub.f32 %v3166_v2, %v3176_v6  ;;  %v3181_v8 = vmul.f32 %v3179_v5, %v3179_v5 }
0x1c98   :  { %v3185_v54 = vsel %vm290_vm0, %v3181_v8, 0.0  ;;  %v3180_v48 = vmul.f32 %v3178_v7, %v3178_v7 }
0x1c99   :  { %3186 = vadd.xlane.f32.xlu1 %v3185_v54 }
0x1c9a   :  { %v3182_v9 = vsel %vm290_vm0, %v3180_v48, 0.0 }
0x1c9b   :  { %3183 = vadd.xlane.f32.xlu0 %v3182_v9 }
0x1d22   :  { %v3187_v14 = vpop.xlane.xlu1 %3186 }
0x1d23   :  { %v3189_v15 = vmul.f32 0.03125, %v3187_v14 }
0x1d24   :  { %v3184_v16 = vpop.xlane.xlu0 %3183 }
0x1d25   :  { %v3191_v17 = vadd.f32 1e-12, %v3189_v15  ;;  %v3188_v18 = vmul.f32 0.03125, %v3184_v16 }
0x1d27   :  { %3882 = vrsqrt.f32 %v3191_v17  ;;  %v3190_v19 = vadd.f32 1e-12, %v3188_v18 }
0x1d29   :  { %3884 = vrsqrt.f32 %v3190_v19 }
0x1d34   :  { %v3883_v37 = vpop.eup %3882 }
0x1d35   :  { %v3195_v21 = vmul.f32 %v3883_v37, %v3179_v5 }
0x1d36   :  { %v3885_v22 = vpop.eup %3884 }
0x1d37   :  { %v3194_v23 = vmul.f32 %v3885_v22, %v3178_v7  ;;  %v3203_v24 = vmul.f32 %v3432_v20, %v3195_v21 }
0x1d39   :  { %v3202_v26 = vmul.f32 %v3432_v20, %v3194_v23  ;;  %v3211_v28 = vadd.f32 %v3433_v25, %v3203_v24 }
0x1d3b   :  { %v3210_v27 = vadd.f32 %v3433_v25, %v3202_v26 }
0x1d3d   :  { %3786 = vmatprep.mubr.msk.f32.mxu0 %vm290_vm0, %v3210_v27 }
0x1d3e   :  { %3787 = vmatmul.mubr.msk.f32.vlgmr.msra.gmra.mxu0 %vm290_vm0, %v3211_v28 }
0x1d3f   :  { %4217 = shalt.err (!%p4214_p0)
}
0x1d40   :  { %3329 = dma.vmem_to_hbm [thread:$0]  %s3324_s11, 256, %s4940_s24, [#allocation30], %s4278_s25, %s4278_s25, %s4279_s8  }
0x1d41   :  { %v3434_v29 = vld [vmem:[%s4938_s22] ss:$0 sm:$0xff]  ;;  %s4296_s1 = smov [#allocation28]  }
0x1d42   :  { %s3311_s17 = sshll.u32 %s4296_s1, 4  ;;  %s3312_s17 = int_to_ptr.vmem [resolvable:$true] %s3311_s17 }
0x1d43   :  { %s4226_s9 = scalar_lea.vmem %s3312_s17, 256  ;;  %p4231_p2 = scmp.lt.s32.totalorder %s3312_s17, %s3312_s17 }
0x1d44   :  { %p4227_p1 = scmp.ne.s32.totalorder %s3312_s17, %s4226_s9  ;;  %p4232_p3 = scmp.lt.s32.totalorder %s4226_s9, %s4226_s9 }
0x1d46   :  { %p4233_p4 = por %p4232_p3, %p4231_p2 }
0x1d48   :  { %p4234_p5 = pnand %p4233_p4, %p4227_p1 }
0x1dfe   :  { %v3788_v36 = vpop.f32.mrf.mxu0 }
0x1dff   :  { %v3301_v30 = vadd.f32 %v3788_v36, %v3434_v29 }
0x1e00   :  { %v3295_v51 = vpop.f32.mrf.mxu0 }
0x1e01   :  { %3305 = vst [vmem:[#allocation28 + $0x8] sm:$0xff] %v3301_v30  ;;  %v3296_v32 = vadd.f32 %v3434_v29, %v3295_v51 }
0x1e03   :  { %3304 = vst [vmem:[#allocation28] sm:$0xff] %v3296_v32 }
0x1e04   :  { %4237 = shalt.err (!%p4234_p5)
}
0x1e05   :  { %3317 = dma.vmem_to_hbm [thread:$0]  %s3312_s17, 256, %s4939_s23, [#allocation4], %s4278_s25, %s4278_s25, %s4279_s8  }
0x1e06   :  { %4264 = dma.done.wait [#allocation4], 256  }
0x1e07   :  { %4265 = vsyncadd [#allocation4], 4294967040 }
0x1e08   :  { %4266 = dma.done.wait [#allocation30], 256  }
0x1e09   :  { %4267 = vsyncadd [#allocation30], 4294967040 }
0x1e0a   :  { %3336 = vsyncpa [#allocation3], 1 }
0x1e0b   :  { %3337 = vsyncpa [#allocation6], 1 }
0x1e0c   :  { %3338 = vsyncpa [#allocation9], 1 }
0x1e0d   :  { %3339 = vsyncpa [#allocation12], 1 }
0x1e0e   :  { %3340 = vsyncpa [#allocation15], 1 }
0x1e0f   :  { %3341 = vsyncpa [#allocation18], 1 }
0x1e10   :  { %3342 = vsyncpa [#allocation21], 1 }
0x1e11   :  { %3343 = vsyncpa [#allocation24], 1 }
0x1e12   :  { %3344 = vsyncpa [#allocation27], 1 }
0x1e13   :  { %3345 = vsyncpa [#allocation4], 1 }
0x1e14   :  { %3346 = vsyncpa [#allocation30], 1 }

</bundles_post_ra>
